<compile_context>
chip_gen: v7x
topology: tpu7x:2x2x1
jax: 0.10.0
libtpu: 0.0.40
codegen_flags: <defaults>
</compile_context>

<pallas_src>
import numpy as np
import jax
import jax.numpy as jnp
from jax import lax
from jax.experimental import pallas as pl
from jax.experimental.pallas import tpu as pltpu

KH = KW = 5
H_IN = W_IN = 32                  # input spatial size implied by Linear(1*1*32, 16)
C1, C2, C3 = 4, 4, 32             # conv output channels
LIN1, LIN2 = 16, 1
ROWS_PER_IMG = 8                  # input packed as 8 rows of 128 (4 image rows each)
TB = 64                           # default batch tile (images per grid step)


# ----------------------------------------------------------------------------
# Host-side parameter glue: fused, pool-aware banded conv matrices.
# ----------------------------------------------------------------------------
def _build_conv1(w, b):
    """w: (4,1,5,5), b: (4,) -> W1f (256, 448) bf16, bias row (1, 448) f32.

    Slab row s of an image holds input rows 4s..4s+7 (8 blocks of 32 cols).
    Output column = P*224 + p*112 + (j%2)*56 + co*14 + j//2, so a 4-way
    lane-block max over (p, j%2) yields MaxPool2d(2,2) row 2s+P, col j//2."""
    wn = np.asarray(w, np.float32)
    bn = np.asarray(b, np.float32)
    W = np.zeros((8 * W_IN, 4 * 112), np.float32)
    bias = np.zeros((1, 4 * 112), np.float32)
    for P in range(2):
        for p in range(2):
            for co in range(C1):
                for j in range(28):
                    col = P * 224 + p * 112 + (j % 2) * 56 + co * 14 + j // 2
                    bias[0, col] = bn[co]
                    for ky in range(KH):
                        for kx in range(KW):
                            W[(2 * P + p + ky) * W_IN + j + kx, col] = wn[co, 0, ky, kx]
    return jnp.asarray(W, jnp.bfloat16), jnp.asarray(bias, jnp.float32)


def _build_conv2(w, b):
    """w: (4,4,5,5), b: (4,) -> W2f (336, 80) bf16, bias row (1, 80) f32.

    Slab row v holds pool1 rows 2v..2v+5 (6 blocks of 56 cols, ci*14 + col).
    Output column = p*40 + (j%2)*20 + co*5 + j//2 (4-way max -> pool2)."""
    wn = np.asarray(w, np.float32)
    bn = np.asarray(b, np.float32)
    W = np.zeros((6 * 56, 80), np.float32)
    bias = np.zeros((1, 80), np.float32)
    for p in range(2):
        for co in range(C2):
            for j in range(10):
                col = p * 40 + (j % 2) * 20 + co * 5 + j // 2
                bias[0, col] = bn[co]
                for ci in range(C1):
                    for ky in range(KH):
                        for kx in range(KW):
                            W[(p + ky) * 56 + ci * 14 + j + kx, col] = wn[co, ci, ky, kx]
    return jnp.asarray(W, jnp.bfloat16), jnp.asarray(bias, jnp.float32)


def _build_conv3(w, b):
    """w: (32,4,5,5) -> W3f (100, 32) bf16 (input layout ky*20 + ci*5 + kx)."""
    wn = np.asarray(w, np.float32)
    W = np.zeros((KH * C2 * 5, C3), np.float32)
    for co in range(C3):
        for ci in range(C2):
            for ky in range(KH):
                for kx in range(KW):
                    W[ky * 20 + ci * 5 + kx, co] = wn[co, ci, ky, kx]
    bias = np.asarray(b, np.float32).reshape(1, C3)
    return jnp.asarray(W, jnp.bfloat16), jnp.asarray(bias, jnp.float32)


# ----------------------------------------------------------------------------
# Pallas kernel: whole HEstimator forward for one batch tile of TB images.
# ----------------------------------------------------------------------------
def _hestimator_kernel(x_ref, w1_ref, b1_ref, bns_ref, bnb_ref,
                       w2_ref, b2_ref, w3_ref, b3_ref,
                       wl1_ref, bl1_ref, wl2_ref, bl2_ref, out_ref):
    f32, bf16 = jnp.float32, jnp.bfloat16
    m = x_ref.shape[0]                        # TB*8 physical rows (8 per image)

    def shift_up(a, k):                       # row i -> a[i+k], zero padded at end
        return jnp.concatenate(
            [a[k:, :], jnp.zeros((k, a.shape[1]), a.dtype)], axis=0)

    def pool4(a, w):                          # max over 4 adjacent w-wide lane blocks
        return jnp.maximum(jnp.maximum(a[:, 0:w], a[:, w:2 * w]),
                           jnp.maximum(a[:, 2 * w:3 * w], a[:, 3 * w:4 * w]))

    # ---- conv1 (1->4, 5x5) + ReLU + MaxPool2d(2,2) ---------------------------
    x = x_ref[...]                                             # (m, 128) bf16
    slab1 = jnp.concatenate([x, shift_up(x, 1)], axis=1)       # (m, 256)
    acc1 = jnp.dot(slab1, w1_ref[...], preferred_element_type=f32) + b1_ref[...]
    acc1 = jnp.maximum(acc1, 0.0)                              # (m, 448) f32
    # Dropout: identity in eval mode.  Pool = lane-block maxima.
    p1 = jnp.concatenate([pool4(acc1[:, 0:224], 56),
                          pool4(acc1[:, 224:448], 56)], axis=1)  # (m, 112)
    # BatchNorm2d(4), eval: running stats folded into per-channel scale/shift.
    p1 = p1 * bns_ref[...] + bnb_ref[...]

    # ---- conv2 (4->4, 5x5) + ReLU + MaxPool2d(2,2) ---------------------------
    p1b = p1.astype(bf16)
    slab2 = jnp.concatenate([p1b, shift_up(p1b, 1), shift_up(p1b, 2)], axis=1)
    acc2 = jnp.dot(slab2, w2_ref[...], preferred_element_type=f32) + b2_ref[...]
    acc2 = jnp.maximum(acc2, 0.0)                              # (m, 80)
    p2 = pool4(acc2, 20).astype(bf16)                          # (m, 20)

    # ---- conv3 (4->32, 5x5 -> 1x1) + ReLU ------------------------------------
    slab3 = jnp.concatenate(
        [p2 if ky == 0 else shift_up(p2, ky) for ky in range(KH)], axis=1)
    feat = jnp.maximum(jnp.dot(slab3, w3_ref[...], preferred_element_type=f32)
                       + b3_ref[...], 0.0)                     # (m, 32) == flatten

    # ---- Linear(32,16) + ReLU + Linear(16,1) ---------------------------------
    h = jnp.maximum(jnp.dot(feat.astype(bf16), wl1_ref[...],
                            preferred_element_type=f32) + bl1_ref[...], 0.0)
    y = jnp.sum(h * wl2_ref[...], axis=1)                      # (m,) f32
    # Lane-dense store; valid scalar for image b sits at lane b*8.
    out_ref[...] = y.reshape(1, 1, m) + bl2_ref[...]


# ----------------------------------------------------------------------------
# Wrapper
# ----------------------------------------------------------------------------
def hestimator_forward(x, p, tb=TB):
    n = x.shape[0]
    assert x.shape[1:] == (1, H_IN, W_IN)
    tb = int(min(tb, max(8, ((n + 7) // 8) * 8)))   # don't over-pad tiny batches
    g = (n + tb - 1) // tb
    n_pad = g * tb
    m = tb * ROWS_PER_IMG

    # (N,1,32,32) -> packed (N*8, 128) bf16: 4 image rows per physical row.
    x4 = x[:, 0, :, :].reshape(n * ROWS_PER_IMG, 4 * W_IN).astype(jnp.bfloat16)
    if n_pad != n:
        x4 = jnp.concatenate(
            [x4, jnp.zeros(((n_pad - n) * ROWS_PER_IMG, 4 * W_IN), jnp.bfloat16)],
            axis=0)

    W1f, b1row = _build_conv1(p["w1"], p["b1"])
    scale = np.asarray(p["bn_gamma"], np.float32) / np.sqrt(
        np.asarray(p["bn_var"], np.float32) + p["bn_eps"])
    shift = np.asarray(p["bn_beta"], np.float32) - np.asarray(p["bn_mean"], np.float32) * scale
    bns = jnp.asarray(np.tile(np.repeat(scale, 14), 2)[None, :], jnp.float32)   # (1,112)
    bnb = jnp.asarray(np.tile(np.repeat(shift, 14), 2)[None, :], jnp.float32)   # (1,112)
    W2f, b2row = _build_conv2(p["w2"], p["b2"])
    W3f, b3row = _build_conv3(p["w3"], p["b3"])
    wl1 = jnp.asarray(np.asarray(p["wl1"], np.float32).T, jnp.bfloat16)         # (32,16)
    bl1 = jnp.asarray(np.asarray(p["bl1"], np.float32)[None, :], jnp.float32)   # (1,16)
    wl2 = jnp.asarray(np.asarray(p["wl2"], np.float32), jnp.float32)            # (1,16)
    bl2 = jnp.asarray(np.asarray(p["bl2"], np.float32)[None, :], jnp.float32)   # (1,1)

    weights = (W1f, b1row, bns, bnb, W2f, b2row, W3f, b3row, wl1, bl1, wl2, bl2)

    # Advisory cost estimate (weights are grid-resident: count them once).
    flops_step = 2 * m * (256 * 448 + 336 * 80 + 100 * 32 + 32 * 16 + 16)
    w_bytes = sum(int(np.prod(w.shape)) * w.dtype.itemsize for w in weights)
    io_bytes_step = m * (4 * W_IN) * 2 + m * 4

    out = pl.pallas_call(
        _hestimator_kernel,
        out_shape=jax.ShapeDtypeStruct((g, 1, m), jnp.float32),
        grid=(g,),
        in_specs=[pl.BlockSpec((m, 4 * W_IN), lambda i: (i, 0))]
                 + [pl.BlockSpec(w.shape, lambda i: (0, 0)) for w in weights],
        out_specs=pl.BlockSpec((1, 1, m), lambda i: (i, 0, 0)),
        compiler_params=pltpu.CompilerParams(
            dimension_semantics=("parallel",)),
        cost_estimate=pl.CostEstimate(flops=flops_step * g, transcendentals=0,
                                      bytes_accessed=io_bytes_step * g + w_bytes),
    )(x4, *weights)

    # Valid scalar for image q is at packed-row offset 0 of its 8-row block.
    return out.reshape(n_pad, ROWS_PER_IMG)[:n, 0:1]


# ----------------------------------------------------------------------------
# Deterministic parameter init + pure-JAX reference for verification
# ----------------------------------------------------------------------------
def init_params(key):
    ks = jax.random.split(key, 14)

    def u(k, shape, fan_in):
        b = 1.0 / float(np.sqrt(fan_in))
        return jax.random.uniform(k, shape, jnp.float32, -b, b)

    p = {}
    p["w1"] = u(ks[0], (C1, 1, KH, KW), 1 * KH * KW)
    p["b1"] = u(ks[1], (C1,), 1 * KH * KW)
    p["w2"] = u(ks[2], (C2, C1, KH, KW), C1 * KH * KW)
    p["b2"] = u(ks[3], (C2,), C1 * KH * KW)
    p["w3"] = u(ks[4], (C3, C2, KH, KW), C2 * KH * KW)
    p["b3"] = u(ks[5], (C3,), C2 * KH * KW)
    p["bn_gamma"] = 1.0 + 0.1 * jax.random.normal(ks[6], (C1,), jnp.float32)
    p["bn_beta"] = 0.1 * jax.random.normal(ks[7], (C1,), jnp.float32)
    p["bn_mean"] = 0.1 * jax.random.normal(ks[8], (C1,), jnp.float32)
    p["bn_var"] = 1.0 + 0.5 * jax.random.uniform(ks[9], (C1,), jnp.float32)
    p["bn_eps"] = 1e-5
    p["wl1"] = u(ks[10], (LIN1, C3), C3)
    p["bl1"] = u(ks[11], (LIN1,), C3)
    p["wl2"] = u(ks[12], (LIN2, LIN1), LIN1)
    p["bl2"] = u(ks[13], (LIN2,), LIN1)
    return p


def reference_forward(x, p):
    def conv(h, w, b):
        y = lax.conv_general_dilated(h, w, (1, 1), "VALID",
                                     dimension_numbers=("NCHW", "OIHW", "NCHW"))
        return y + b[None, :, None, None]

    def maxpool(h):
        return lax.reduce_window(h, -jnp.inf, lax.max,
                                 (1, 1, 2, 2), (1, 1, 2, 2), "VALID")

    h = jax.nn.relu(conv(x, p["w1"], p["b1"]))
    h = maxpool(h)
    h = ((h - p["bn_mean"][None, :, None, None])
         / jnp.sqrt(p["bn_var"][None, :, None, None] + p["bn_eps"])
         * p["bn_gamma"][None, :, None, None] + p["bn_beta"][None, :, None, None])
    h = jax.nn.relu(conv(h, p["w2"], p["b2"]))
    h = maxpool(h)
    h = jax.nn.relu(conv(h, p["w3"], p["b3"]))
    h = h.reshape(h.shape[0], -1)
    h = jax.nn.relu(h @ p["wl1"].T + p["bl1"])
    return h @ p["wl2"].T + p["bl2"]


if __name__ == "__main__":
    key = jax.random.PRNGKey(0)
    pkey, xkey = jax.random.split(key)
    params = init_params(pkey)
    x = jax.random.normal(xkey, (2, 1, H_IN, W_IN), jnp.float32)

    y = hestimator_forward(x, params)
    y = jax.block_until_ready(y)
    assert y.shape == (2, 1), y.shape

    y_ref = reference_forward(x, params)
    err = float(jnp.max(jnp.abs(y - y_ref)))
    tol = 5e-2 + 5e-2 * float(jnp.max(jnp.abs(y_ref)))  # bf16 matmul operands
    assert err <= tol, f"mismatch vs reference: max abs err {err} (tol {tol})"

    print("KERNEL_OK")
</pallas_src>

<mosaic_0001>
module attributes {stable_mosaic.version = 11 : i64} {
  func.func @_hestimator_kernel(%arg0: i32, %arg1: memref<64x128xbf16, #tpu.memory_space<vmem>>, %arg2: memref<256x448xbf16, #tpu.memory_space<vmem>>, %arg3: memref<1x448xf32, #tpu.memory_space<vmem>>, %arg4: memref<1x112xf32, #tpu.memory_space<vmem>>, %arg5: memref<1x112xf32, #tpu.memory_space<vmem>>, %arg6: memref<336x80xbf16, #tpu.memory_space<vmem>>, %arg7: memref<1x80xf32, #tpu.memory_space<vmem>>, %arg8: memref<100x32xbf16, #tpu.memory_space<vmem>>, %arg9: memref<1x32xf32, #tpu.memory_space<vmem>>, %arg10: memref<32x16xbf16, #tpu.memory_space<vmem>>, %arg11: memref<1x16xf32, #tpu.memory_space<vmem>>, %arg12: memref<1x16xf32, #tpu.memory_space<vmem>>, %arg13: memref<1x1xf32, #tpu.memory_space<vmem>>, %arg14: memref<1x1x64xf32, #tpu.memory_space<vmem>>) attributes {dimension_semantics = [#tpu.dimension_semantics<parallel>], iteration_bounds = array<i64: 1>, scalar_prefetch = 0 : i64, scratch_operands = 0 : i64, tpu.core_type = #tpu.core_type<tc>, window_params = [{transform_indices = @transform_0, window_bounds = array<i64: 64, 128>}, {pipeline_mode = #tpu.pipeline_mode<synchronous>, transform_indices = @transform_1, window_bounds = array<i64: 256, 448>}, {pipeline_mode = #tpu.pipeline_mode<synchronous>, transform_indices = @transform_2, window_bounds = array<i64: 1, 448>}, {pipeline_mode = #tpu.pipeline_mode<synchronous>, transform_indices = @transform_3, window_bounds = array<i64: 1, 112>}, {pipeline_mode = #tpu.pipeline_mode<synchronous>, transform_indices = @transform_4, window_bounds = array<i64: 1, 112>}, {pipeline_mode = #tpu.pipeline_mode<synchronous>, transform_indices = @transform_5, window_bounds = array<i64: 336, 80>}, {pipeline_mode = #tpu.pipeline_mode<synchronous>, transform_indices = @transform_6, window_bounds = array<i64: 1, 80>}, {pipeline_mode = #tpu.pipeline_mode<synchronous>, transform_indices = @transform_7, window_bounds = array<i64: 100, 32>}, {pipeline_mode = #tpu.pipeline_mode<synchronous>, transform_indices = @transform_8, window_bounds = array<i64: 1, 32>}, {pipeline_mode = #tpu.pipeline_mode<synchronous>, transform_indices = @transform_9, window_bounds = array<i64: 32, 16>}, {pipeline_mode = #tpu.pipeline_mode<synchronous>, transform_indices = @transform_10, window_bounds = array<i64: 1, 16>}, {pipeline_mode = #tpu.pipeline_mode<synchronous>, transform_indices = @transform_11, window_bounds = array<i64: 1, 16>}, {pipeline_mode = #tpu.pipeline_mode<synchronous>, transform_indices = @transform_12, window_bounds = array<i64: 1, 1>}, {transform_indices = @transform_13, window_bounds = array<i64: 1, 1, 64>}]} {
    %c0 = arith.constant 0 : index
    %c0_0 = arith.constant 0 : index
    %0 = vector.load %arg1[%c0, %c0_0] : memref<64x128xbf16, #tpu.memory_space<vmem>>, vector<64x128xbf16>
    %1 = vector.extract_strided_slice %0 {offsets = [1, 0], sizes = [63, 128], strides = [1, 1]} : vector<64x128xbf16> to vector<63x128xbf16>
    %cst = arith.constant 0.000000e+00 : bf16
    %2 = vector.broadcast %cst : bf16 to vector<1x128xbf16>
    %3 = tpu.concatenate %1, %2 in 0 : vector<63x128xbf16>, vector<1x128xbf16> -> vector<64x128xbf16>
    %4 = tpu.concatenate %0, %3 in 1 : vector<64x128xbf16>, vector<64x128xbf16> -> vector<64x256xbf16>
    %c0_1 = arith.constant 0 : index
    %c0_2 = arith.constant 0 : index
    %5 = vector.load %arg2[%c0_1, %c0_2] : memref<256x448xbf16, #tpu.memory_space<vmem>>, vector<256x448xbf16>
    %cst_3 = arith.constant dense<0.000000e+00> : vector<64x448xf32>
    %6 = tpu.matmul %4, %5, %cst_3 {dimension_numbers = #tpu.dot_dimension_numbers<[1], [0], [0], [1], [0, 0, 1, 1], [], []>} : vector<64x256xbf16>, vector<256x448xbf16>, vector<64x448xf32> -> vector<64x448xf32>
    %c0_4 = arith.constant 0 : index
    %c0_5 = arith.constant 0 : index
    %7 = vector.load %arg3[%c0_4, %c0_5] : memref<1x448xf32, #tpu.memory_space<vmem>>, vector<1x448xf32>
    %8 = vector.broadcast %7 : vector<1x448xf32> to vector<64x448xf32>
    %9 = arith.addf %6, %8 : vector<64x448xf32>
    %cst_6 = arith.constant 0.000000e+00 : f32
    %10 = vector.broadcast %cst_6 : f32 to vector<64x448xf32>
    %11 = arith.maximumf %9, %10 : vector<64x448xf32>
    %12 = vector.extract_strided_slice %11 {offsets = [0, 0], sizes = [64, 224], strides = [1, 1]} : vector<64x448xf32> to vector<64x224xf32>
    %13 = vector.extract_strided_slice %12 {offsets = [0, 0], sizes = [64, 56], strides = [1, 1]} : vector<64x224xf32> to vector<64x56xf32>
    %14 = vector.extract_strided_slice %12 {offsets = [0, 56], sizes = [64, 56], strides = [1, 1]} : vector<64x224xf32> to vector<64x56xf32>
    %15 = arith.maximumf %13, %14 : vector<64x56xf32>
    %16 = vector.extract_strided_slice %12 {offsets = [0, 112], sizes = [64, 56], strides = [1, 1]} : vector<64x224xf32> to vector<64x56xf32>
    %17 = vector.extract_strided_slice %12 {offsets = [0, 168], sizes = [64, 56], strides = [1, 1]} : vector<64x224xf32> to vector<64x56xf32>
    %18 = arith.maximumf %16, %17 : vector<64x56xf32>
    %19 = arith.maximumf %15, %18 : vector<64x56xf32>
    %20 = vector.extract_strided_slice %11 {offsets = [0, 224], sizes = [64, 224], strides = [1, 1]} : vector<64x448xf32> to vector<64x224xf32>
    %21 = vector.extract_strided_slice %20 {offsets = [0, 0], sizes = [64, 56], strides = [1, 1]} : vector<64x224xf32> to vector<64x56xf32>
    %22 = vector.extract_strided_slice %20 {offsets = [0, 56], sizes = [64, 56], strides = [1, 1]} : vector<64x224xf32> to vector<64x56xf32>
    %23 = arith.maximumf %21, %22 : vector<64x56xf32>
    %24 = vector.extract_strided_slice %20 {offsets = [0, 112], sizes = [64, 56], strides = [1, 1]} : vector<64x224xf32> to vector<64x56xf32>
    %25 = vector.extract_strided_slice %20 {offsets = [0, 168], sizes = [64, 56], strides = [1, 1]} : vector<64x224xf32> to vector<64x56xf32>
    %26 = arith.maximumf %24, %25 : vector<64x56xf32>
    %27 = arith.maximumf %23, %26 : vector<64x56xf32>
    %28 = tpu.concatenate %19, %27 in 1 : vector<64x56xf32>, vector<64x56xf32> -> vector<64x112xf32>
    %c0_7 = arith.constant 0 : index
    %c0_8 = arith.constant 0 : index
    %29 = vector.load %arg4[%c0_7, %c0_8] : memref<1x112xf32, #tpu.memory_space<vmem>>, vector<1x112xf32>
    %30 = vector.broadcast %29 : vector<1x112xf32> to vector<64x112xf32>
    %31 = arith.mulf %28, %30 : vector<64x112xf32>
    %c0_9 = arith.constant 0 : index
    %c0_10 = arith.constant 0 : index
    %32 = vector.load %arg5[%c0_9, %c0_10] : memref<1x112xf32, #tpu.memory_space<vmem>>, vector<1x112xf32>
    %33 = vector.broadcast %32 : vector<1x112xf32> to vector<64x112xf32>
    %34 = arith.addf %31, %33 : vector<64x112xf32>
    %35 = arith.truncf %34 : vector<64x112xf32> to vector<64x112xbf16>
    %36 = vector.extract_strided_slice %35 {offsets = [1, 0], sizes = [63, 112], strides = [1, 1]} : vector<64x112xbf16> to vector<63x112xbf16>
    %cst_11 = arith.constant 0.000000e+00 : bf16
    %37 = vector.broadcast %cst_11 : bf16 to vector<1x112xbf16>
    %38 = tpu.concatenate %36, %37 in 0 : vector<63x112xbf16>, vector<1x112xbf16> -> vector<64x112xbf16>
    %39 = vector.extract_strided_slice %35 {offsets = [2, 0], sizes = [62, 112], strides = [1, 1]} : vector<64x112xbf16> to vector<62x112xbf16>
    %cst_12 = arith.constant 0.000000e+00 : bf16
    %40 = vector.broadcast %cst_12 : bf16 to vector<2x112xbf16>
    %41 = tpu.concatenate %39, %40 in 0 : vector<62x112xbf16>, vector<2x112xbf16> -> vector<64x112xbf16>
    %42 = tpu.concatenate %35, %38, %41 in 1 : vector<64x112xbf16>, vector<64x112xbf16>, vector<64x112xbf16> -> vector<64x336xbf16>
    %c0_13 = arith.constant 0 : index
    %c0_14 = arith.constant 0 : index
    %43 = vector.load %arg6[%c0_13, %c0_14] : memref<336x80xbf16, #tpu.memory_space<vmem>>, vector<336x80xbf16>
    %cst_15 = arith.constant dense<0.000000e+00> : vector<64x80xf32>
    %44 = tpu.matmul %42, %43, %cst_15 {dimension_numbers = #tpu.dot_dimension_numbers<[1], [0], [0], [1], [0, 0, 1, 1], [], []>} : vector<64x336xbf16>, vector<336x80xbf16>, vector<64x80xf32> -> vector<64x80xf32>
    %c0_16 = arith.constant 0 : index
    %c0_17 = arith.constant 0 : index
    %45 = vector.load %arg7[%c0_16, %c0_17] : memref<1x80xf32, #tpu.memory_space<vmem>>, vector<1x80xf32>
    %46 = vector.broadcast %45 : vector<1x80xf32> to vector<64x80xf32>
    %47 = arith.addf %44, %46 : vector<64x80xf32>
    %cst_18 = arith.constant 0.000000e+00 : f32
    %48 = vector.broadcast %cst_18 : f32 to vector<64x80xf32>
    %49 = arith.maximumf %47, %48 : vector<64x80xf32>
    %50 = vector.extract_strided_slice %49 {offsets = [0, 0], sizes = [64, 20], strides = [1, 1]} : vector<64x80xf32> to vector<64x20xf32>
    %51 = vector.extract_strided_slice %49 {offsets = [0, 20], sizes = [64, 20], strides = [1, 1]} : vector<64x80xf32> to vector<64x20xf32>
    %52 = arith.maximumf %50, %51 : vector<64x20xf32>
    %53 = vector.extract_strided_slice %49 {offsets = [0, 40], sizes = [64, 20], strides = [1, 1]} : vector<64x80xf32> to vector<64x20xf32>
    %54 = vector.extract_strided_slice %49 {offsets = [0, 60], sizes = [64, 20], strides = [1, 1]} : vector<64x80xf32> to vector<64x20xf32>
    %55 = arith.maximumf %53, %54 : vector<64x20xf32>
    %56 = arith.maximumf %52, %55 : vector<64x20xf32>
    %57 = arith.truncf %56 : vector<64x20xf32> to vector<64x20xbf16>
    %58 = vector.extract_strided_slice %57 {offsets = [1, 0], sizes = [63, 20], strides = [1, 1]} : vector<64x20xbf16> to vector<63x20xbf16>
    %cst_19 = arith.constant 0.000000e+00 : bf16
    %59 = vector.broadcast %cst_19 : bf16 to vector<1x20xbf16>
    %60 = tpu.concatenate %58, %59 in 0 : vector<63x20xbf16>, vector<1x20xbf16> -> vector<64x20xbf16>
    %61 = vector.extract_strided_slice %57 {offsets = [2, 0], sizes = [62, 20], strides = [1, 1]} : vector<64x20xbf16> to vector<62x20xbf16>
    %cst_20 = arith.constant 0.000000e+00 : bf16
    %62 = vector.broadcast %cst_20 : bf16 to vector<2x20xbf16>
    %63 = tpu.concatenate %61, %62 in 0 : vector<62x20xbf16>, vector<2x20xbf16> -> vector<64x20xbf16>
    %64 = vector.extract_strided_slice %57 {offsets = [3, 0], sizes = [61, 20], strides = [1, 1]} : vector<64x20xbf16> to vector<61x20xbf16>
    %cst_21 = arith.constant 0.000000e+00 : bf16
    %65 = vector.broadcast %cst_21 : bf16 to vector<3x20xbf16>
    %66 = tpu.concatenate %64, %65 in 0 : vector<61x20xbf16>, vector<3x20xbf16> -> vector<64x20xbf16>
    %67 = vector.extract_strided_slice %57 {offsets = [4, 0], sizes = [60, 20], strides = [1, 1]} : vector<64x20xbf16> to vector<60x20xbf16>
    %cst_22 = arith.constant 0.000000e+00 : bf16
    %68 = vector.broadcast %cst_22 : bf16 to vector<4x20xbf16>
    %69 = tpu.concatenate %67, %68 in 0 : vector<60x20xbf16>, vector<4x20xbf16> -> vector<64x20xbf16>
    %70 = tpu.concatenate %57, %60, %63, %66, %69 in 1 : vector<64x20xbf16>, vector<64x20xbf16>, vector<64x20xbf16>, vector<64x20xbf16>, vector<64x20xbf16> -> vector<64x100xbf16>
    %c0_23 = arith.constant 0 : index
    %c0_24 = arith.constant 0 : index
    %71 = vector.load %arg8[%c0_23, %c0_24] : memref<100x32xbf16, #tpu.memory_space<vmem>>, vector<100x32xbf16>
    %cst_25 = arith.constant dense<0.000000e+00> : vector<64x32xf32>
    %72 = tpu.matmul %70, %71, %cst_25 {dimension_numbers = #tpu.dot_dimension_numbers<[1], [0], [0], [1], [0, 0, 1, 1], [], []>} : vector<64x100xbf16>, vector<100x32xbf16>, vector<64x32xf32> -> vector<64x32xf32>
    %c0_26 = arith.constant 0 : index
    %c0_27 = arith.constant 0 : index
    %73 = vector.load %arg9[%c0_26, %c0_27] : memref<1x32xf32, #tpu.memory_space<vmem>>, vector<1x32xf32>
    %74 = vector.broadcast %73 : vector<1x32xf32> to vector<64x32xf32>
    %75 = arith.addf %72, %74 : vector<64x32xf32>
    %cst_28 = arith.constant 0.000000e+00 : f32
    %76 = vector.broadcast %cst_28 : f32 to vector<64x32xf32>
    %77 = arith.maximumf %75, %76 : vector<64x32xf32>
    %78 = arith.truncf %77 : vector<64x32xf32> to vector<64x32xbf16>
    %c0_29 = arith.constant 0 : index
    %c0_30 = arith.constant 0 : index
    %79 = vector.load %arg10[%c0_29, %c0_30] : memref<32x16xbf16, #tpu.memory_space<vmem>>, vector<32x16xbf16>
    %cst_31 = arith.constant dense<0.000000e+00> : vector<64x16xf32>
    %80 = tpu.matmul %78, %79, %cst_31 {dimension_numbers = #tpu.dot_dimension_numbers<[1], [0], [0], [1], [0, 0, 1, 1], [], []>} : vector<64x32xbf16>, vector<32x16xbf16>, vector<64x16xf32> -> vector<64x16xf32>
    %c0_32 = arith.constant 0 : index
    %c0_33 = arith.constant 0 : index
    %81 = vector.load %arg11[%c0_32, %c0_33] : memref<1x16xf32, #tpu.memory_space<vmem>>, vector<1x16xf32>
    %82 = vector.broadcast %81 : vector<1x16xf32> to vector<64x16xf32>
    %83 = arith.addf %80, %82 : vector<64x16xf32>
    %cst_34 = arith.constant 0.000000e+00 : f32
    %84 = vector.broadcast %cst_34 : f32 to vector<64x16xf32>
    %85 = arith.maximumf %83, %84 : vector<64x16xf32>
    %c0_35 = arith.constant 0 : index
    %c0_36 = arith.constant 0 : index
    %86 = vector.load %arg12[%c0_35, %c0_36] : memref<1x16xf32, #tpu.memory_space<vmem>>, vector<1x16xf32>
    %87 = vector.broadcast %86 : vector<1x16xf32> to vector<64x16xf32>
    %88 = arith.mulf %85, %87 : vector<64x16xf32>
    %cst_37 = arith.constant dense<0.000000e+00> : vector<64xf32>
    %89 = vector.multi_reduction <add>, %88, %cst_37 [1] : vector<64x16xf32> to vector<64xf32>
    %90 = vector.shape_cast %89 : vector<64xf32> to vector<1x1x64xf32>
    %c0_38 = arith.constant 0 : index
    %c0_39 = arith.constant 0 : index
    %91 = vector.load %arg13[%c0_38, %c0_39] : memref<1x1xf32, #tpu.memory_space<vmem>>, vector<1x1xf32>
    %92 = vector.shape_cast %91 : vector<1x1xf32> to vector<1x1x1xf32>
    %93 = vector.broadcast %92 : vector<1x1x1xf32> to vector<1x1x64xf32>
    %94 = arith.addf %90, %93 : vector<1x1x64xf32>
    %c0_40 = arith.constant 0 : index
    %c0_41 = arith.constant 0 : index
    %c0_42 = arith.constant 0 : index
    %95 = vector.load %arg14[%c0_40, %c0_41, %c0_42] : memref<1x1x64xf32, #tpu.memory_space<vmem>>, vector<1x1x64xf32>
    tpu.vector_store %arg14[%c0_40, %c0_41, %c0_42], %94 {strides = array<i32>} : memref<1x1x64xf32, #tpu.memory_space<vmem>>, vector<1x1x64xf32>,
    return
  }
  func.func @transform_0(%arg0: i32) -> (i32, i32) {
    %c0_i32 = arith.constant 0 : i32
    %c0_i32_0 = arith.constant 0 : i32
    return %arg0, %c0_i32 : i32, i32
  }
  func.func @transform_1(%arg0: i32) -> (i32, i32) {
    %c0_i32 = arith.constant 0 : i32
    %c0_i32_0 = arith.constant 0 : i32
    %c0_i32_1 = arith.constant 0 : i32
    return %c0_i32, %c0_i32_0 : i32, i32
  }
  func.func @transform_2(%arg0: i32) -> (i32, i32) {
    %c0_i32 = arith.constant 0 : i32
    %c0_i32_0 = arith.constant 0 : i32
    %c0_i32_1 = arith.constant 0 : i32
    return %c0_i32, %c0_i32_0 : i32, i32
  }
  func.func @transform_3(%arg0: i32) -> (i32, i32) {
    %c0_i32 = arith.constant 0 : i32
    %c0_i32_0 = arith.constant 0 : i32
    %c0_i32_1 = arith.constant 0 : i32
    return %c0_i32, %c0_i32_0 : i32, i32
  }
  func.func @transform_4(%arg0: i32) -> (i32, i32) {
    %c0_i32 = arith.constant 0 : i32
    %c0_i32_0 = arith.constant 0 : i32
    %c0_i32_1 = arith.constant 0 : i32
    return %c0_i32, %c0_i32_0 : i32, i32
  }
  func.func @transform_5(%arg0: i32) -> (i32, i32) {
    %c0_i32 = arith.constant 0 : i32
    %c0_i32_0 = arith.constant 0 : i32
    %c0_i32_1 = arith.constant 0 : i32
    return %c0_i32, %c0_i32_0 : i32, i32
  }
  func.func @transform_6(%arg0: i32) -> (i32, i32) {
    %c0_i32 = arith.constant 0 : i32
    %c0_i32_0 = arith.constant 0 : i32
    %c0_i32_1 = arith.constant 0 : i32
    return %c0_i32, %c0_i32_0 : i32, i32
  }
  func.func @transform_7(%arg0: i32) -> (i32, i32) {
    %c0_i32 = arith.constant 0 : i32
    %c0_i32_0 = arith.constant 0 : i32
    %c0_i32_1 = arith.constant 0 : i32
    return %c0_i32, %c0_i32_0 : i32, i32
  }
  func.func @transform_8(%arg0: i32) -> (i32, i32) {
    %c0_i32 = arith.constant 0 : i32
    %c0_i32_0 = arith.constant 0 : i32
    %c0_i32_1 = arith.constant 0 : i32
    return %c0_i32, %c0_i32_0 : i32, i32
  }
  func.func @transform_9(%arg0: i32) -> (i32, i32) {
    %c0_i32 = arith.constant 0 : i32
    %c0_i32_0 = arith.constant 0 : i32
    %c0_i32_1 = arith.constant 0 : i32
    return %c0_i32, %c0_i32_0 : i32, i32
  }
  func.func @transform_10(%arg0: i32) -> (i32, i32) {
    %c0_i32 = arith.constant 0 : i32
    %c0_i32_0 = arith.constant 0 : i32
    %c0_i32_1 = arith.constant 0 : i32
    return %c0_i32, %c0_i32_0 : i32, i32
  }
  func.func @transform_11(%arg0: i32) -> (i32, i32) {
    %c0_i32 = arith.constant 0 : i32
    %c0_i32_0 = arith.constant 0 : i32
    %c0_i32_1 = arith.constant 0 : i32
    return %c0_i32, %c0_i32_0 : i32, i32
  }
  func.func @transform_12(%arg0: i32) -> (i32, i32) {
    %c0_i32 = arith.constant 0 : i32
    %c0_i32_0 = arith.constant 0 : i32
    %c0_i32_1 = arith.constant 0 : i32
    return %c0_i32, %c0_i32_0 : i32, i32
  }
  func.func @transform_13(%arg0: i32) -> (i32, i32, i32) {
    %c0_i32 = arith.constant 0 : i32
    %c0_i32_0 = arith.constant 0 : i32
    %c0_i32_1 = arith.constant 0 : i32
    return %arg0, %c0_i32, %c0_i32_0 : i32, i32, i32
  }
}

</mosaic_0001>

<bundles_post_ra>
// kernel: tpu_custom_call.1
= control target key start
LH: loop header
LB: loop body
LE: loop exit
PB: predicated region body
PF: predicated region fallthrough
CT: control target
= control target key end

     0   :  { %s3686_s0 = inlined_call_operand.vmem [shape: bf16[64,128], index: 0, kind: input, shape index: {}]   ;;  %s3687_s1 = inlined_call_operand.vmem [shape: bf16[256,448], index: 1, kind: input, shape index: {}]   ;;  %s3688_s2 = inlined_call_operand.vmem [shape: f32[1,448], index: 2, kind: input, shape index: {}]   ;;  %s3689_s3 = inlined_call_operand.vmem [shape: f32[1,112], index: 3, kind: input, shape index: {}]   ;;  %s3690_s4 = inlined_call_operand.vmem [shape: f32[1,112], index: 4, kind: input, shape index: {}]   ;;  %s3691_s5 = inlined_call_operand.vmem [shape: bf16[336,80], index: 5, kind: input, shape index: {}]   ;;  %s3692_s6 = inlined_call_operand.vmem [shape: f32[1,80], index: 6, kind: input, shape index: {}]   ;;  %s3693_s7 = inlined_call_operand.vmem [shape: bf16[100,32], index: 7, kind: input, shape index: {}]   ;;  %s3694_s8 = inlined_call_operand.vmem [shape: f32[1,32], index: 8, kind: input, shape index: {}]   ;;  %s3695_s9 = inlined_call_operand.vmem [shape: bf16[32,16], index: 9, kind: input, shape index: {}]   ;;  %s3696_s10 = inlined_call_operand.vmem [shape: f32[1,16], index: 10, kind: input, shape index: {}]   ;;  %s3697_s11 = inlined_call_operand.vmem [shape: f32[1,16], index: 11, kind: input, shape index: {}]   ;;  %s3698_s12 = inlined_call_operand.<no memory space> [shape: f32[1,1], index: 12, kind: input, shape index: {}]   ;;  %s3699_s13 = inlined_call_operand.hbm [shape: f32[1,1,64], index: 13, kind: output, shape index: {}]  }
   0x1   :  { %v18_v0 = vstv %s3698_s12 }
   0x2   :  { %19 = vst [vmem:[#allocation2] sm:$0x1] %v18_v0 }
   0x3   :  { %v2485_v1 = vld [vmem:[%s3687_s1 + $0xc] ss:$16 sps:$4 sm:$0xff]   ;;  %v2487_v2 = vld [vmem:[%s3687_s1 + $0x8] ss:$16 sps:$4 sm:$0xff]   ;;  %v2488_v3 = vld [vmem:[%s3687_s1 + $0x4] ss:$16 sps:$4 sm:$0xff]  }
   0x4   :  { %598 = vmatprep.subr.bf16.mxu1 %v2485_v1  ;;  %v2490_v4 = vld [vmem:[%s3687_s1] ss:$16 sps:$4 sm:$0xff]   ;;  %v2491_v5 = vld [vmem:[%s3687_s1 + $0x2c] ss:$16 sps:$4 sm:$0xff]   ;;  %v2493_v6 = vld [vmem:[%s3687_s1 + $0x28] ss:$16 sps:$4 sm:$0xff]   ;;  %525 = vmatprep.subr.bf16.mxu0 %v2488_v3 }
   0x5   :  { %599 = vmatpush1.bf16.msra.mxu1 %v2487_v2  ;;  %v2494_v7 = vld [vmem:[%s3687_s1 + $0x24] ss:$16 sps:$4 sm:$0xff]   ;;  %526 = vmatpush1.bf16.msra.mxu0 %v2490_v4  ;;  %v2496_v8 = vld [vmem:[%s3687_s1 + $0x20] ss:$16 sps:$4 sm:$0xff]   ;;  %v2497_v9 = vld [vmem:[%s3687_s1 + $0x4c] ss:$16 sps:$4 sm:$0xff]  }
   0x6   :  { %600 = vmatprep.subr.bf16.mxu1 %v2491_v5  ;;  %527 = vmatprep.subr.bf16.mxu0 %v2494_v7  ;;  %v2499_v10 = vld [vmem:[%s3687_s1 + $0x48] ss:$16 sps:$4 sm:$0xff]   ;;  %v2500_v11 = vld [vmem:[%s3687_s1 + $0x44] ss:$16 sps:$4 sm:$0xff]   ;;  %v2503_v12 = vld [vmem:[%s3687_s1 + $0x6c] ss:$16 sps:$4 sm:$0xff]  }
   0x7   :  { %v2502_v13 = vld [vmem:[%s3687_s1 + $0x40] ss:$16 sps:$4 sm:$0xff]   ;;  %v2506_v14 = vld [vmem:[%s3687_s1 + $0x64] ss:$16 sps:$4 sm:$0xff]   ;;  %v2505_v15 = vld [vmem:[%s3687_s1 + $0x68] ss:$16 sps:$4 sm:$0xff]  }
   0x8   :  { %v2509_v16 = vld [vmem:[%s3687_s1 + $0x8c] ss:$16 sps:$4 sm:$0xff]   ;;  %v2508_v17 = vld [vmem:[%s3687_s1 + $0x60] ss:$16 sps:$4 sm:$0xff]   ;;  %v2512_v18 = vld [vmem:[%s3687_s1 + $0x84] ss:$16 sps:$4 sm:$0xff]  }
   0x9   :  { %601 = vmatpush1.bf16.msra.mxu1 %v2493_v6  ;;  %528 = vmatpush1.bf16.msra.mxu0 %v2496_v8  ;;  %v2511_v19 = vld [vmem:[%s3687_s1 + $0x88] ss:$16 sps:$4 sm:$0xff]   ;;  %v2515_v20 = vld [vmem:[%s3687_s1 + $0xac] ss:$16 sps:$4 sm:$0xff]   ;;  %v2514_v21 = vld [vmem:[%s3687_s1 + $0x80] ss:$16 sps:$4 sm:$0xff]  }
   0xa   :  { %602 = vmatprep.subr.bf16.mxu1 %v2497_v9  ;;  %529 = vmatprep.subr.bf16.mxu0 %v2500_v11  ;;  %v2518_v22 = vld [vmem:[%s3687_s1 + $0xa4] ss:$16 sps:$4 sm:$0xff]   ;;  %v2517_v23 = vld [vmem:[%s3687_s1 + $0xa8] ss:$16 sps:$4 sm:$0xff]   ;;  %v2521_v24 = vld [vmem:[%s3687_s1 + $0xcc] ss:$16 sps:$4 sm:$0xff]  }
   0xb   :  { %v2520_v25 = vld [vmem:[%s3687_s1 + $0xa0] ss:$16 sps:$4 sm:$0xff]   ;;  %v2524_v26 = vld [vmem:[%s3687_s1 + $0xc4] ss:$16 sps:$4 sm:$0xff]   ;;  %v2523_v27 = vld [vmem:[%s3687_s1 + $0xc8] ss:$16 sps:$4 sm:$0xff]  }
   0xc   :  { %v2527_v28 = vld [vmem:[%s3687_s1 + $0xec] ss:$16 sps:$4 sm:$0xff]   ;;  %v2526_v29 = vld [vmem:[%s3687_s1 + $0xc0] ss:$16 sps:$4 sm:$0xff]   ;;  %v2530_v30 = vld [vmem:[%s3687_s1 + $0xe4] ss:$16 sps:$4 sm:$0xff]  }
   0xd   :  { %603 = vmatpush1.bf16.msra.mxu1 %v2499_v10  ;;  %530 = vmatpush1.bf16.msra.mxu0 %v2502_v13  ;;  %v2529_v31 = vld [vmem:[%s3687_s1 + $0xe8] ss:$16 sps:$4 sm:$0xff]   ;;  %v2533_v32 = vld [vmem:[%s3687_s1 + $0x10c] ss:$16 sps:$4 sm:$0xff]   ;;  %v2532_v33 = vld [vmem:[%s3687_s1 + $0xe0] ss:$16 sps:$4 sm:$0xff]  }
   0xe   :  { %604 = vmatprep.subr.bf16.mxu1 %v2503_v12  ;;  %531 = vmatprep.subr.bf16.mxu0 %v2506_v14  ;;  %v2536_v34 = vld [vmem:[%s3687_s1 + $0x104] ss:$16 sps:$4 sm:$0xff]   ;;  %v2535_v35 = vld [vmem:[%s3687_s1 + $0x108] ss:$16 sps:$4 sm:$0xff]   ;;  %v2539_v36 = vld [vmem:[%s3687_s1 + $0x12c] ss:$16 sps:$4 sm:$0xff]  }
   0xf   :  { %v2538_v37 = vld [vmem:[%s3687_s1 + $0x100] ss:$16 sps:$4 sm:$0xff]   ;;  %v2542_v38 = vld [vmem:[%s3687_s1 + $0x124] ss:$16 sps:$4 sm:$0xff]   ;;  %v2541_v39 = vld [vmem:[%s3687_s1 + $0x128] ss:$16 sps:$4 sm:$0xff]  }
  0x10   :  { %v2545_v40 = vld [vmem:[%s3687_s1 + $0x14c] ss:$16 sps:$4 sm:$0xff]   ;;  %v2544_v41 = vld [vmem:[%s3687_s1 + $0x120] ss:$16 sps:$4 sm:$0xff]   ;;  %v2548_v42 = vld [vmem:[%s3687_s1 + $0x144] ss:$16 sps:$4 sm:$0xff]  }
  0x11   :  { %605 = vmatpush1.bf16.msra.mxu1 %v2505_v15  ;;  %532 = vmatpush1.bf16.msra.mxu0 %v2508_v17  ;;  %v2547_v43 = vld [vmem:[%s3687_s1 + $0x148] ss:$16 sps:$4 sm:$0xff]   ;;  %v2550_v44 = vld [vmem:[%s3687_s1 + $0x140] ss:$16 sps:$4 sm:$0xff]   ;;  %v2551_v45 = vld [vmem:[%s3687_s1 + $0x16c] ss:$16 sps:$4 sm:$0xff]  }
  0x12   :  { %606 = vmatprep.subr.bf16.mxu1 %v2509_v16  ;;  %533 = vmatprep.subr.bf16.mxu0 %v2512_v18  ;;  %v2553_v46 = vld [vmem:[%s3687_s1 + $0x168] ss:$16 sps:$4 sm:$0xff]   ;;  %v2554_v47 = vld [vmem:[%s3687_s1 + $0x164] ss:$16 sps:$4 sm:$0xff]   ;;  %vm76_vm0 = vsmask.f32 7424 }
  0x13   :  { %v2557_v48 = vld [vmem:[%s3687_s1 + $0x18c] ss:$16 sps:$4 sm:$0xff]   ;;  %v2556_v49 = vld [vmem:[%s3687_s1 + $0x160] ss:$16 sps:$4 sm:$0xff]   ;;  %v2560_v51 = vld [vmem:[%s3687_s1 + $0x184] ss:$16 sps:$4 sm:$0xff]  }
  0x14   :  { %v2580_v50 = vld [vmem:[%s3686_s0] sm:$0xff]   ;;  %v2880_v52 = vld [vmem:[%s3686_s0 + $0x8] sm:$0xff]   ;;  %v2888_v56 = vld [vmem:[%s3686_s0 + $0x10] sm:$0xff]  }
  0x15   :  { %607 = vmatpush1.bf16.msra.mxu1 %v2511_v19  ;;  %534 = vmatpush1.bf16.msra.mxu0 %v2514_v21  ;;  %v2559_v53 = vld [vmem:[%s3687_s1 + $0x188] ss:$16 sps:$4 sm:$0xff]   ;;  %v78_v54 = vshrl.u32 %v2580_v50, 16  ;;  %v80_v55 = vshll.u32 %v2580_v50, 16  ;;  %v85_v58 = vshll.u32 %v2880_v52, 16  ;;  %v89_v62 = vshrl.u32 %v2880_v52, 16 }
  0x16   :  { %608 = vmatprep.subr.bf16.mxu1 %v2515_v20  ;;  %535 = vmatprep.subr.bf16.mxu0 %v2518_v22  ;;  %v2893_v57 = vld [vmem:[%s3686_s0 + $0x18] sm:$0xff]   ;;  %v2562_v59 = vld [vmem:[%s3687_s1 + $0x180] ss:$16 sps:$4 sm:$0xff]   ;;  %v2566_v63 = vld [vmem:[%s3687_s1 + $0x1a4] ss:$16 sps:$4 sm:$0xff]   ;;  %v93_v1 = vshll.u32 %v2888_v56, 16 }
  0x17   :  { %v2563_v60 = vld [vmem:[%s3687_s1 + $0x1ac] ss:$16 sps:$4 sm:$0xff]   ;;  %v82_v61 = vrot.slane %v80_v55, 1  ;;  %v87_v0 = vrot.slane %v85_v58, 1  ;;  %v2565_v2 = vld [vmem:[%s3687_s1 + $0x1a8] ss:$16 sps:$4 sm:$0xff]  }
  0x18   :  { %v97_v4 = vshrl.u32 %v2888_v56, 16  ;;  %v101_v5 = vshll.u32 %v2893_v57, 16  ;;  %v2569_v6 = vld [vmem:[%s3687_s1 + $0x1cc] ss:$16 sps:$4 sm:$0xff]   ;;  %v2568_v7 = vld [vmem:[%s3687_s1 + $0x1a0] ss:$16 sps:$4 sm:$0xff]  }
  0x19   :  { %609 = vmatpush1.bf16.msra.mxu1 %v2517_v23  ;;  %536 = vmatpush1.bf16.msra.mxu0 %v2520_v25  ;;  %v83_v3 = vor.u32 %v82_v61, %v78_v54  ;;  %v2572_v9 = vld [vmem:[%s3687_s1 + $0x1c4] ss:$16 sps:$4 sm:$0xff]   ;;  %v2571_v10 = vld [vmem:[%s3687_s1 + $0x1c8] ss:$16 sps:$4 sm:$0xff]   ;;  %v95_v11 = vrot.slane %v93_v1, 1  ;;  %v91_v18 = vor.u32 %v89_v62, %v87_v0 }
  0x1a   :  { %610 = vmatprep.subr.bf16.mxu1 %v2521_v24  ;;  %537 = vmatprep.subr.bf16.mxu0 %v2524_v26  ;;  %v103_v12 = vrot.slane %v101_v5, 1  ;;  %v2575_v13 = vld [vmem:[%s3687_s1 + $0x1ec] ss:$16 sps:$4 sm:$0xff]   ;;  %v2574_v14 = vld [vmem:[%s3687_s1 + $0x1c0] ss:$16 sps:$4 sm:$0xff]  }
  0x1b   :  { %v88_v8 = vsel %vm76_vm0, %v83_v3, %v87_v0  ;;  %v2578_v15 = vld [vmem:[%s3687_s1 + $0x1e4] ss:$16 sps:$4 sm:$0xff]   ;;  %v2577_v16 = vld [vmem:[%s3687_s1 + $0x1e8] ss:$16 sps:$4 sm:$0xff]   ;;  %v2582_v17 = vld [vmem:[%s3687_s1 + $0x1e0] ss:$16 sps:$4 sm:$0xff]   ;;  %v96_v19 = vsel %vm76_vm0, %v91_v18, %v95_v11  ;;  %v99_v20 = vor.u32 %v97_v4, %v95_v11 }
  0x1c   :  { %630 = vmatprep.mubr.bf16.mxu1 %v88_v8  ;;  %557 = vmatprep.mubr.bf16.mxu0 %v88_v8 }
  0x1d   :  { %611 = vmatpush1.bf16.msra.mxu1 %v2523_v27  ;;  %538 = vmatpush1.bf16.msra.mxu0 %v2526_v29 }
  0x1e   :  { %612 = vmatprep.subr.bf16.mxu1 %v2527_v28  ;;  %539 = vmatprep.subr.bf16.mxu0 %v2530_v30 }
  0x21   :  { %613 = vmatpush1.bf16.msra.mxu1 %v2529_v31  ;;  %540 = vmatpush1.bf16.msra.mxu0 %v2532_v33 }
  0x22   :  { %614 = vmatprep.subr.bf16.mxu1 %v2533_v32  ;;  %541 = vmatprep.subr.bf16.mxu0 %v2536_v34 }
  0x25   :  { %615 = vmatpush1.bf16.msra.mxu1 %v2535_v35  ;;  %542 = vmatpush1.bf16.msra.mxu0 %v2538_v37 }
  0x26   :  { %616 = vmatprep.subr.bf16.mxu1 %v2539_v36  ;;  %543 = vmatprep.subr.bf16.mxu0 %v2542_v38 }
  0x29   :  { %617 = vmatpush1.bf16.msra.mxu1 %v2541_v39  ;;  %544 = vmatpush1.bf16.msra.mxu0 %v2544_v41 }
  0x2a   :  { %618 = vmatprep.subr.bf16.mxu1 %v2545_v40  ;;  %545 = vmatprep.subr.bf16.mxu0 %v2548_v42 }
  0x2d   :  { %619 = vmatpush1.bf16.msra.mxu1 %v2547_v43  ;;  %546 = vmatpush1.bf16.msra.mxu0 %v2550_v44 }
  0x2e   :  { %620 = vmatprep.subr.bf16.mxu1 %v2551_v45  ;;  %547 = vmatprep.subr.bf16.mxu0 %v2554_v47 }
  0x31   :  { %621 = vmatpush1.bf16.msra.mxu1 %v2553_v46  ;;  %548 = vmatpush1.bf16.msra.mxu0 %v2556_v49 }
  0x32   :  { %622 = vmatprep.subr.bf16.mxu1 %v2557_v48  ;;  %549 = vmatprep.subr.bf16.mxu0 %v2560_v51 }
  0x35   :  { %623 = vmatpush1.bf16.msra.mxu1 %v2559_v53  ;;  %550 = vmatpush1.bf16.msra.mxu0 %v2562_v59 }
  0x36   :  { %624 = vmatprep.subr.bf16.mxu1 %v2563_v60  ;;  %551 = vmatprep.subr.bf16.mxu0 %v2566_v63 }
  0x39   :  { %625 = vmatpush1.bf16.msra.mxu1 %v2565_v2  ;;  %552 = vmatpush1.bf16.msra.mxu0 %v2568_v7 }
  0x3a   :  { %626 = vmatprep.subr.bf16.mxu1 %v2569_v6  ;;  %553 = vmatprep.subr.bf16.mxu0 %v2572_v9 }
  0x3d   :  { %627 = vmatpush1.bf16.msra.mxu1 %v2571_v10  ;;  %554 = vmatpush1.bf16.msra.mxu0 %v2574_v14 }
  0x3e   :  { %628 = vmatprep.subr.bf16.mxu1 %v2575_v13  ;;  %555 = vmatprep.subr.bf16.mxu0 %v2578_v15 }
  0x41   :  { %629 = vmatpush1.bf16.msra.mxu1 %v2577_v16  ;;  %556 = vmatpush1.bf16.msra.mxu0 %v2582_v17 }
  0x44   :  { %631 = vmatmul.mubr.bf16.vlgmr.msra.gmra.mrb[0].mxu1 %v2580_v50  ;;  %558 = vmatmul.mubr.bf16.vlgmr.msra.gmra.mrb[0].mxu0 %v2580_v50 }
  0x45   :  { %640 = vmatprep.mubr.bf16.mxu1 %v96_v19 }
  0x46   :  { %20 = vsyncpa [#allocation4], 0  ;;  %567 = vmatprep.mubr.bf16.mxu0 %v96_v19  ;;  %v104_v21 = vsel %vm76_vm0, %v99_v20, %v103_v12  ;;  %v105_v22 = vshrl.u32 %v2893_v57, 16  ;;  %vm112_vm1 = vcmask 1047552   ;;  %v185_v26 = vlaneseq  ;;  %v183_v29 = vld [vmem:[%s3688_s2] sm:$0xf] }
  0x47   :  { %vm2946_vm2 = vmand %vm112_vm1, %vm76_vm0  ;;  %s2639_s2 = smov 72   ;;  %s2640_s18 = smov 16   ;;  %vm839_vm3 = vcmask 130048   ;;  %vm1096_vm4 = vcmask 719872   ;;  %vm1113_vm5 = vcmask 457728   ;;  %vm1193_vm6 = vcmask 1046528  }
  0x48   :  { %v107_v23 = vor.u32 %v105_v22, %v103_v12  ;;  %v2957_v27 = vshrl.u32 %v185_v26, 7  ;;  %s2641_s19 = smov 88   ;;  %s2643_s24 = smov 112   ;;  %vm1424_vm7 = vcmask 654336   ;;  %vm1223_vm8 = vcmask 916480  }
  0x49   :  { %vm1236_vm9 = vcmask 785408   ;;  %vm1720_vm10 = vcmask 1045504   ;;  %vm1870_vm11 = vcmask 1041408   ;;  %vm1701_vm12 = vsmask.f32 6400  ;;  %s2648_s20 = smov 60  }
  0x4a   :  { %v114_v25 = vsel %vm2946_vm2, %v107_v23, 0  ;;  %v195_v28 = vsub.s32 2, %v2957_v27  ;;  %v199_v30 = vsub.s32 3, %v2957_v27  ;;  %v191_v32 = vsub.s32 1, %v2957_v27  ;;  %vm1718_vm13 = vmand %vm1193_vm6, %vm1701_vm12 }
  0x4b   :  { %v187_v0 = vsub.s32 0, %v2957_v27  ;;  %vm1767_vm14 = vcmask 162816   ;;  %vm1776_vm15 = vcmask 326656   ;;  %vm1861_vm1 = vcmask 818176  }
  0x4c   :  { %641 = vmatmul.mubr.bf16.gmra.mrb[4].mxu1 %v2880_v52  ;;  %568 = vmatmul.mubr.bf16.gmra.mrb[4].mxu0 %v2880_v52  ;;  %v2964_v31 = vrot.slane %v183_v29, %v195_v28  ;;  %v2967_v33 = vrot.slane %v183_v29, %v199_v30  ;;  %v2970_v37 = vrot.slane %v183_v29, %v191_v32 }
  0x4d   :  { %650 = vmatprep.mubr.bf16.mxu1 %v104_v21  ;;  %577 = vmatprep.mubr.bf16.mxu0 %v104_v21  ;;  %v3024_v6 = vrot.slane %v183_v29, %v187_v0 }
  0x54   :  { %651 = vmatmul.mubr.bf16.gmra.mrb[8].mxu1 %v2888_v56  ;;  %578 = vmatmul.mubr.bf16.gmra.mrb[8].mxu0 %v2888_v56 }
  0x55   :  { %660 = vmatprep.mubr.bf16.mxu1 %v114_v25  ;;  %587 = vmatprep.mubr.bf16.mxu0 %v114_v25 }
  0x5c   :  { %661 = vmatmul.mubr.bf16.gmra.mrb[12].mxu1 %v2893_v57  ;;  %588 = vmatmul.mubr.bf16.gmra.mrb[12].mxu0 %v2893_v57 }
 0x117   :  { %v632_v34 = vpop.f32.mrb[0].mxu1  ;;  %v2972_v39 = vpop.f32.mrb[0].mxu0 }
 0x118   :  { %v633_v35 = vadd.f32 %v632_v34, %v2964_v31  ;;  %v634_v36 = vpop.f32.mrb[1].mxu1  ;;  %v561_v44 = vpop.f32.mrb[1].mxu0 }
 0x119   :  { %v636_v38 = vpop.f32.mrb[2].mxu1  ;;  %v2977_v41 = vadd.f32 %v634_v36, %v2967_v33  ;;  %v2980_v45 = vpop.f32.mrb[2].mxu0  ;;  %v562_v47 = vadd.f32 %v561_v44, %v2970_v37 }
 0x11a   :  { %v2974_v40 = vmax.f32 %v633_v35, 0.0  ;;  %v637_v42 = vadd.f32 %v636_v38, %v2964_v31  ;;  %v638_v43 = vpop.f32.mrb[3].mxu1  ;;  %v565_v48 = vpop.f32.mrb[3].mxu0 }
 0x11b   :  { %v566_v49 = vadd.f32 %v565_v48, %v2970_v37  ;;  %v674_v50 = vmax.f32 %v2977_v41, 0.0  ;;  %v2993_v53 = vmax.f32 %v562_v47, 0.0  ;;  %v3004_v58 = vadd.f32 %v638_v43, %v2967_v33 }
 0x11c   :  { %v2982_v46 = vmax.f32 %v637_v42, 0.0  ;;  %872 = vrot.lane.b32.xlu0 %v2974_v40, %s2639_s2 }
 0x11d   :  { %v2991_v51 = vmax.f32 %v566_v49, 0.0  ;;  %v678_v3 = vmax.f32 %v3004_v58, 0.0 }
 0x11e   :  { %874 = vrot.lane.b32.xlu1 %v2982_v46, %s2639_s2 }
 0x11f   :  { %v642_v52 = vpop.f32.mrb[4].mxu1  ;;  %v3001_v57 = vpop.f32.mrb[4].mxu0 }
 0x120   :  { %920 = vrot.lane.b32.xlu0 %v674_v50, %s2639_s2  ;;  %v644_v54 = vpop.f32.mrb[5].mxu1  ;;  %v571_v61 = vpop.f32.mrb[5].mxu0  ;;  %v643_v1 = vadd.f32 %v642_v52, %v2964_v31 }
 0x121   :  { %v2999_v55 = vadd.f32 %v644_v54, %v2967_v33  ;;  %v646_v56 = vpop.f32.mrb[6].mxu1  ;;  %v3010_v63 = vpop.f32.mrb[6].mxu0  ;;  %v572_v9 = vadd.f32 %v571_v61, %v2970_v37 }
 0x122   :  { %753 = vrot.lane.b32.xlu1 %v2991_v51, %s2639_s2  ;;  %v647_v59 = vadd.f32 %v646_v56, %v2964_v31  ;;  %v648_v60 = vpop.f32.mrb[7].mxu1  ;;  %v575_v2 = vpop.f32.mrb[7].mxu0  ;;  %v3026_v7 = vmax.f32 %v643_v1, 0.0 }
 0x123   :  { %v682_v62 = vmax.f32 %v2999_v55, 0.0  ;;  %v3029_v8 = vadd.f32 %v648_v60, %v2967_v33  ;;  %v576_v13 = vadd.f32 %v575_v2, %v2970_v37  ;;  %v3042_v19 = vmax.f32 %v572_v9, 0.0 }
 0x124   :  { %751 = vrot.lane.b32.xlu0 %v2993_v53, %s2639_s2  ;;  %v3017_v4 = vmax.f32 %v647_v59, 0.0 }
 0x125   :  { %v686_v18 = vmax.f32 %v3029_v8, 0.0  ;;  %v3052_v23 = vmax.f32 %v576_v13, 0.0  ;;  %v564_v13 = vadd.f32 %v2980_v45, %v3024_v6 }
 0x126   :  { %924 = vrot.lane.b32.xlu1 %v682_v62, %s2639_s2 }
 0x127   :  { %v652_v5 = vpop.f32.mrb[8].mxu1  ;;  %v579_v12 = vpop.f32.mrb[8].mxu0 }
 0x128   :  { %922 = vrot.lane.b32.xlu0 %v678_v3, %s2639_s2  ;;  %v654_v10 = vpop.f32.mrb[9].mxu1  ;;  %v3039_v15 = vadd.f32 %v579_v12, %v3024_v6  ;;  %v581_v16 = vpop.f32.mrb[9].mxu0  ;;  %v653_v61 = vadd.f32 %v652_v5, %v2964_v31 }
 0x129   :  { %v656_v11 = vpop.f32.mrb[10].mxu1  ;;  %v583_v17 = vpop.f32.mrb[10].mxu0  ;;  %v3047_v20 = vadd.f32 %v654_v10, %v2967_v33  ;;  %v582_v30 = vadd.f32 %v581_v16, %v2970_v37  ;;  %v560_v16 = vadd.f32 %v2972_v39, %v3024_v6 }
 0x12a   :  { %878 = vrot.lane.b32.xlu1 %v3017_v4, %s2639_s2  ;;  %v658_v14 = vpop.f32.mrb[11].mxu1  ;;  %v3050_v21 = vadd.f32 %v583_v17, %v3024_v6  ;;  %v585_v22 = vpop.f32.mrb[11].mxu0  ;;  %v657_v2 = vadd.f32 %v656_v11, %v2964_v31  ;;  %v3102_v9 = vmax.f32 %v653_v61, 0.0 }
 0x12b   :  { %v3058_v25 = vadd.f32 %v658_v14, %v2967_v33  ;;  %v690_v29 = vmax.f32 %v3047_v20, 0.0  ;;  %v586_v38 = vadd.f32 %v585_v22, %v2970_v37  ;;  %v3071_v48 = vmax.f32 %v582_v30, 0.0 }
 0x12c   :  { %876 = vrot.lane.b32.xlu0 %v3026_v7, %s2639_s2  ;;  %v3107_v5 = vmax.f32 %v657_v2, 0.0  ;;  %v574_v22 = vadd.f32 %v3010_v63, %v3024_v6  ;;  %v3135_v45 = vmax.f32 %v560_v16, 0.0 }
 0x12d   :  { %v694_v36 = vmax.f32 %v3058_v25, 0.0  ;;  %v3082_v56 = vmax.f32 %v586_v38, 0.0 }
 0x12e   :  { %926 = vrot.lane.b32.xlu1 %v686_v18, %s2639_s2  ;;  %v3142_v30 = vmax.f32 %v574_v22, 0.0 }
 0x12f   :  { %v662_v28 = vpop.f32.mrb[12].mxu1  ;;  %v589_v35 = vpop.f32.mrb[12].mxu0 }
 0x130   :  { %755 = vrot.lane.b32.xlu0 %v3042_v19, %s2639_s2  ;;  %v664_v32 = vpop.f32.mrb[13].mxu1  ;;  %v3069_v43 = vadd.f32 %v589_v35, %v3024_v6  ;;  %v591_v44 = vpop.f32.mrb[13].mxu0  ;;  %v663_v11 = vadd.f32 %v662_v28, %v2964_v31  ;;  %v570_v28 = vadd.f32 %v3001_v57, %v3024_v6 }
 0x131   :  { %v666_v34 = vpop.f32.mrb[14].mxu1  ;;  %v593_v47 = vpop.f32.mrb[14].mxu0  ;;  %v3077_v49 = vadd.f32 %v664_v32, %v2967_v33 }
 0x132   :  { %757 = vrot.lane.b32.xlu1 %v3052_v23, %s2639_s2  ;;  %v668_v42 = vpop.f32.mrb[15].mxu1  ;;  %v3080_v52 = vadd.f32 %v593_v47, %v3024_v6  ;;  %v595_v54 = vpop.f32.mrb[15].mxu0  ;;  %v667_v10 = vadd.f32 %v666_v34, %v2964_v31  ;;  %v3125_v17 = vmax.f32 %v663_v11, 0.0  ;;  %v3129_v31 = vmax.f32 %v564_v13, 0.0 }
 0x133   :  { %v3088_v59 = vadd.f32 %v668_v42, %v2967_v33  ;;  %v698_v60 = vmax.f32 %v3077_v49, 0.0  ;;  %v592_v33 = vadd.f32 %v591_v44, %v2970_v37  ;;  %v596_v39 = vadd.f32 %v595_v54, %v2970_v37 }
 0x134   :  { %928 = vrot.lane.b32.xlu0 %v690_v29, %s2639_s2  ;;  %v3119_v14 = vmax.f32 %v667_v10, 0.0  ;;  %v3146_v32 = vmax.f32 %v570_v28, 0.0 }
 0x135   :  { %v702_v1 = vmax.f32 %v3088_v59, 0.0  ;;  %v3110_v12 = vmax.f32 %v592_v33, 0.0  ;;  %v3148_v63 = vmax.f32 %v596_v39, 0.0 }
 0x136   :  { %930 = vrot.lane.b32.xlu1 %v694_v36, %s2639_s2 }
 0x138   :  { %759 = vrot.lane.b32.xlu0 %v3071_v48, %s2639_s2 }
 0x13a   :  { %761 = vrot.lane.b32.xlu1 %v3082_v56, %s2639_s2 }
 0x13c   :  { %932 = vrot.lane.b32.xlu0 %v698_v60, %s2639_s2 }
 0x13e   :  { %934 = vrot.lane.b32.xlu1 %v702_v1, %s2639_s2 }
 0x140   :  { %880 = vrot.lane.b32.xlu0 %v3102_v9, %s2639_s2 }
 0x142   :  { %882 = vrot.lane.b32.xlu1 %v3107_v5, %s2639_s2 }
 0x144   :  { %763 = vrot.lane.b32.xlu0 %v3110_v12, %s2639_s2 }
 0x146   :  { %886 = vrot.lane.b32.xlu1 %v3119_v14, %s2639_s2 }
 0x148   :  { %884 = vrot.lane.b32.xlu0 %v3125_v17, %s2639_s2 }
 0x14a   :  { %713 = vrot.lane.b32.xlu1 %v3129_v31, %s2639_s2 }
 0x14c   :  { %711 = vrot.lane.b32.xlu0 %v3135_v45, %s2639_s2 }
 0x14e   :  { %717 = vrot.lane.b32.xlu1 %v3142_v30, %s2639_s2 }
 0x150   :  { %715 = vrot.lane.b32.xlu0 %v3146_v32, %s2639_s2 }
 0x152   :  { %765 = vrot.lane.b32.xlu1 %v3148_v63, %s2639_s2 }
 0x18e   :  { %v3156_v57 = vpop.permute.xlu0 %872 }
 0x190   :  { %v3158_v37 = vpop.permute.xlu1 %874 }
 0x192   :  { %v921_v6 = vpop.permute.xlu0 %920 }
 0x193   :  { %v944_v34 = vmax.f32 %v2974_v40, %v921_v6  ;;  %v945_v35 = vmax.f32 %v674_v50, %v921_v6 }
 0x194   :  { %v754_v38 = vpop.permute.xlu1 %753 }
 0x195   :  { %978 = vrot.lane.b32.xlu1 %v945_v35, %s2640_s18  ;;  %976 = vrot.lane.b32.xlu0 %v944_v34, %s2640_s18  ;;  %v777_v10 = vmax.f32 %v3129_v31, %v754_v38  ;;  %v778_v11 = vmax.f32 %v2991_v51, %v754_v38 }
 0x196   :  { %v752_v42 = vpop.permute.xlu0 %751 }
 0x197   :  { %v775_v44 = vmax.f32 %v3135_v45, %v752_v42  ;;  %v776_v47 = vmax.f32 %v2993_v53, %v752_v42 }
 0x198   :  { %v925_v54 = vpop.permute.xlu1 %924 }
 0x199   :  { %809 = vrot.lane.b32.xlu1 %v776_v47, %s2640_s18  ;;  %807 = vrot.lane.b32.xlu0 %v775_v44, %s2640_s18  ;;  %v948_v58 = vmax.f32 %v3026_v7, %v925_v54 }
 0x19a   :  { %v923_v61 = vpop.permute.xlu0 %922 }
 0x19b   :  { %v946_v41 = vmax.f32 %v2982_v46, %v923_v61  ;;  %v947_v50 = vmax.f32 %v678_v3, %v923_v61  ;;  %v949_v3 = vmax.f32 %v682_v62, %v925_v54 }
 0x19c   :  { %v3172_v2 = vpop.permute.xlu1 %878 }
 0x19d   :  { %982 = vrot.lane.b32.xlu1 %v947_v50, %s2640_s18  ;;  %980 = vrot.lane.b32.xlu0 %v946_v41, %s2640_s18  ;;  %v3228_v41 = vmax.f32 %v3050_v21, 0.0 }
 0x19e   :  { %v3176_v33 = vpop.permute.xlu0 %876 }
 0x1a0   :  { %v927_v13 = vpop.permute.xlu1 %926 }
 0x1a1   :  { %813 = vrot.lane.b32.xlu1 %v778_v11, %s2640_s18  ;;  %811 = vrot.lane.b32.xlu0 %v777_v10, %s2640_s18  ;;  %v950_v39 = vmax.f32 %v3017_v4, %v927_v13  ;;  %v951_v6 = vmax.f32 %v686_v18, %v927_v13 }
 0x1a2   :  { %v756_v16 = vpop.permute.xlu0 %755 }
 0x1a3   :  { %v780_v54 = vmax.f32 %v3042_v19, %v756_v16 }
 0x1a4   :  { %v758_v22 = vpop.permute.xlu1 %757 }
 0x1a5   :  { %986 = vrot.lane.b32.xlu1 %v949_v3, %s2640_s18  ;;  %984 = vrot.lane.b32.xlu0 %v948_v58, %s2640_s18  ;;  %v782_v61 = vmax.f32 %v3052_v23, %v758_v22  ;;  %v3247_v58 = vmax.f32 %v3069_v43, 0.0  ;;  %v3250_v3 = vmax.f32 %v3080_v52, 0.0 }
 0x1a6   :  { %v929_v28 = vpop.permute.xlu0 %928 }
 0x1a7   :  { %v952_v55 = vmax.f32 %v3102_v9, %v929_v28  ;;  %v953_v62 = vmax.f32 %v690_v29, %v929_v28 }
 0x1a8   :  { %v931_v34 = vpop.permute.xlu1 %930 }
 0x1a9   :  { %990 = vrot.lane.b32.xlu1 %v951_v6, %s2640_s18  ;;  %988 = vrot.lane.b32.xlu0 %v950_v39, %s2640_s18  ;;  %v954_v42 = vmax.f32 %v3107_v5, %v931_v34  ;;  %v955_v8 = vmax.f32 %v694_v36, %v931_v34  ;;  %v779_v36 = vmax.f32 %v3146_v32, %v756_v16 }
 0x1aa   :  { %v760_v35 = vpop.permute.xlu0 %759 }
 0x1ab   :  { %v784_v10 = vmax.f32 %v3071_v48, %v760_v35 }
 0x1ac   :  { %v762_v38 = vpop.permute.xlu1 %761 }
 0x1ad   :  { %994 = vrot.lane.b32.xlu1 %v953_v62, %s2640_s18  ;;  %992 = vrot.lane.b32.xlu0 %v952_v55, %s2640_s18  ;;  %v785_v21 = vmax.f32 %v3228_v41, %v762_v38  ;;  %v786_v13 = vmax.f32 %v3082_v56, %v762_v38  ;;  %v896_v62 = vmax.f32 %v2993_v53, %v3156_v57 }
 0x1ae   :  { %v933_v18 = vpop.permute.xlu0 %932  ;;  %v897_v38 = vmax.f32 %v2974_v40, %v3156_v57  ;;  %v898_v40 = vmax.f32 %v2991_v51, %v3158_v37  ;;  %v899_v57 = vmax.f32 %v2982_v46, %v3158_v37  ;;  %v900_v46 = vmax.f32 %v3042_v19, %v3176_v33 }
 0x1af   :  { %v956_v44 = vmax.f32 %v3125_v17, %v933_v18  ;;  %v957_v20 = vmax.f32 %v698_v60, %v933_v18  ;;  %v781_v60 = vmax.f32 %v3142_v30, %v758_v22  ;;  %v901_v37 = vmax.f32 %v3026_v7, %v3176_v33 }
 0x1b0   :  { %v935_v29 = vpop.permute.xlu1 %934 }
 0x1b1   :  { %998 = vrot.lane.b32.xlu1 %v955_v8, %s2640_s18  ;;  %996 = vrot.lane.b32.xlu0 %v954_v42, %s2640_s18  ;;  %v958_v47 = vmax.f32 %v3119_v14, %v935_v29  ;;  %v959_v25 = vmax.f32 %v702_v1, %v935_v29  ;;  %v3225_v1 = vmax.f32 %v3039_v15, 0.0 }
 0x1b2   :  { %v3238_v15 = vpop.permute.xlu0 %880 }
 0x1b3   :  { %v783_v50 = vmax.f32 %v3225_v1, %v760_v35 }
 0x1b4   :  { %v3214_v49 = vpop.permute.xlu1 %882 }
 0x1b5   :  { %1002 = vrot.lane.b32.xlu1 %v957_v20, %s2640_s18  ;;  %1000 = vrot.lane.b32.xlu0 %v956_v44, %s2640_s18 }
 0x1b6   :  { %v764_v22 = vpop.permute.xlu0 %763 }
 0x1b7   :  { %v787_v28 = vmax.f32 %v3247_v58, %v764_v22  ;;  %v788_v39 = vmax.f32 %v3110_v12, %v764_v22 }
 0x1b8   :  { %v3222_v59 = vpop.permute.xlu1 %886 }
 0x1b9   :  { %1006 = vrot.lane.b32.xlu1 %v959_v25, %s2640_s18  ;;  %1004 = vrot.lane.b32.xlu0 %v958_v47, %s2640_s18 }
 0x1ba   :  { %v3264_v34 = vpop.permute.xlu0 %884 }
 0x1bc   :  { %v714_v11 = vpop.permute.xlu1 %713 }
 0x1bd   :  { %817 = vrot.lane.b32.xlu1 %v780_v54, %s2640_s18  ;;  %815 = vrot.lane.b32.xlu0 %v779_v36, %s2640_s18 }
 0x1be   :  { %v712_v35 = vpop.permute.xlu0 %711 }
 0x1bf   :  { %v735_v29 = vmax.f32 %v3135_v45, %v712_v35 }
 0x1c0   :  { %v3244_v16 = vpop.permute.xlu1 %717 }
 0x1c1   :  { %821 = vrot.lane.b32.xlu1 %v782_v61, %s2640_s18  ;;  %819 = vrot.lane.b32.xlu0 %v781_v60, %s2640_s18 }
 0x1c2   :  { %v3266_v55 = vpop.permute.xlu0 %715 }
 0x1c4   :  { %v766_v6 = vpop.permute.xlu1 %765 }
 0x1c5   :  { %721 = vrot.lane.b32.xlu1 %v3228_v41, %s2639_s2  ;;  %719 = vrot.lane.b32.xlu0 %v3225_v1, %s2639_s2  ;;  %v789_v43 = vmax.f32 %v3250_v3, %v766_v6  ;;  %v790_v52 = vmax.f32 %v3148_v63, %v766_v6 }
 0x1c9   :  { %825 = vrot.lane.b32.xlu1 %v784_v10, %s2640_s18  ;;  %823 = vrot.lane.b32.xlu0 %v783_v50, %s2640_s18  ;;  %v736_v10 = vmax.f32 %v3129_v31, %v714_v11  ;;  %v902_v11 = vmax.f32 %v3052_v23, %v3172_v2  ;;  %v905_v23 = vmax.f32 %v3102_v9, %v3238_v15 }
 0x1cd   :  { %829 = vrot.lane.b32.xlu1 %v786_v13, %s2640_s18  ;;  %827 = vrot.lane.b32.xlu0 %v785_v21, %s2640_s18 }
 0x1d1   :  { %725 = vrot.lane.b32.xlu1 %v3250_v3, %s2639_s2  ;;  %723 = vrot.lane.b32.xlu0 %v3247_v58, %s2639_s2  ;;  %s2645_s2 = smov 40  }
 0x1d5   :  { %833 = vrot.lane.b32.xlu1 %v788_v39, %s2640_s18  ;;  %831 = vrot.lane.b32.xlu0 %v787_v28, %s2640_s18 }
 0x1d9   :  { %837 = vrot.lane.b32.xlu1 %v790_v52, %s2640_s18  ;;  %835 = vrot.lane.b32.xlu0 %v789_v43, %s2640_s18  ;;  %v903_v52 = vmax.f32 %v3017_v4, %v3172_v2 }
 0x207   :  { %v979_v42 = vpop.permute.xlu1 %978  ;;  %v977_v8 = vpop.permute.xlu0 %976 }
 0x208   :  { %v1008_v18 = vsel %vm839_vm3, %v977_v8, %v979_v42  ;;  %v1032_v44 = vmax.f32 %v896_v62, %v977_v8 }
 0x209   :  { %v1033_v20 = vmax.f32 %v897_v38, %v1008_v18  ;;  %v904_v38 = vmax.f32 %v3071_v48, %v3238_v15  ;;  %v907_v48 = vmax.f32 %v3107_v5, %v3214_v49 }
 0x20a   :  { %1064 = vrot.lane.b32.xlu0 %v1032_v44, %s2641_s19  ;;  %v906_v44 = vmax.f32 %v3082_v56, %v3214_v49  ;;  %v909_v56 = vmax.f32 %v3125_v17, %v3264_v34 }
 0x20b   :  { %v810_v47 = vpop.permute.xlu1 %809  ;;  %1066 = vrot.lane.b32.xlu1 %v1033_v20, %s2641_s19  ;;  %v808_v25 = vpop.permute.xlu0 %807 }
 0x20c   :  { %v840_v53 = vsel %vm839_vm3, %v808_v25, %v810_v47  ;;  %v908_v25 = vmax.f32 %v3110_v12, %v3264_v34  ;;  %v911_v12 = vmax.f32 %v3119_v14, %v3222_v59  ;;  %v2586_v14 = vld [vmem:[%s3691_s5] sm:$0xff]  }
 0x20d   :  { %v3277_v36 = vmax.f32 %v735_v29, %v840_v53 }
 0x20f   :  { %v983_v54 = vpop.permute.xlu1 %982  ;;  %v981_v60 = vpop.permute.xlu0 %980 }
 0x210   :  { %v1009_v61 = vsel %vm839_vm3, %v981_v60, %v983_v54  ;;  %v1034_v50 = vmax.f32 %v898_v40, %v981_v60  ;;  %v910_v54 = vmax.f32 %v3148_v63, %v3222_v59  ;;  %v2585_v63 = vld [vmem:[%s3691_s5 + $0x40] sm:$0xff]   ;;  %v2587_v59 = vld [vmem:[%s3691_s5 + $0x48] sm:$0xff]  }
 0x211   :  { %v1035_v45 = vmax.f32 %v899_v57, %v1009_v61  ;;  %2313 = vmatprep.subr.bf16.mxu0 %v2585_v63 }
 0x212   :  { %1068 = vrot.lane.b32.xlu0 %v1034_v50, %s2641_s19  ;;  %2314 = vmatpush3.bf16.msra.mxu0 %v2586_v14 }
 0x213   :  { %v814_v21 = vpop.permute.xlu1 %813  ;;  %1070 = vrot.lane.b32.xlu1 %v1035_v45, %s2641_s19  ;;  %v812_v13 = vpop.permute.xlu0 %811  ;;  %v2592_v45 = vld [vmem:[%s3691_s5 + $0x80] sm:$0xff]   ;;  %2315 = vmatprep.subr.bf16.mxu0 %v2587_v59 }
 0x214   :  { %v841_v22 = vsel %vm839_vm3, %v812_v13, %v814_v21  ;;  %v2596_v21 = vld [vmem:[%s3691_s5 + $0x88] sm:$0xff]   ;;  %v2589_v13 = vld [vmem:[%s3691_s5 + $0x50] sm:$0xff]   ;;  %2379 = vmatprep.subr.bf16.mxu1 %v2592_v45 }
 0x215   :  { %v3288_v51 = vmax.f32 %v736_v10, %v841_v22  ;;  %v2588_v10 = vld [vmem:[%s3691_s5 + $0x8] sm:$0xff]   ;;  %2380 = vmatpush3.bf16.msra.mxu1 %v2592_v45  ;;  %v2601_v22 = vld [vmem:[%s3691_s5 + $0x90] sm:$0xff]  }
 0x216   :  { %2381 = vmatprep.subr.bf16.mxu1 %v2596_v21  ;;  %2316 = vmatpush3.bf16.msra.mxu0 %v2588_v10  ;;  %v738_v10 = vmax.f32 %v3142_v30, %v3244_v16 }
 0x217   :  { %v987_v28 = vpop.permute.xlu1 %986  ;;  %v985_v39 = vpop.permute.xlu0 %984  ;;  %2317 = vmatprep.subr.bf16.mxu0 %v2589_v13  ;;  %v2603_v13 = vld [vmem:[%s3691_s5 + $0x38] sm:$0xff]  }
 0x218   :  { %v1010_v6 = vsel %vm839_vm3, %v985_v39, %v987_v28  ;;  %v1036_v43 = vmax.f32 %v900_v46, %v985_v39  ;;  %v2590_v46 = vld [vmem:[%s3691_s5 + $0x10] sm:$0xff]   ;;  %v2593_v28 = vld [vmem:[%s3691_s5 + $0x18] sm:$0xff]   ;;  %v2594_v39 = vld [vmem:[%s3691_s5 + $0x60] sm:$0xff]  }
 0x219   :  { %v1037_v31 = vmax.f32 %v901_v37, %v1010_v6  ;;  %v2591_v37 = vld [vmem:[%s3691_s5 + $0x58] sm:$0xff]   ;;  %2382 = vmatpush3.bf16.msra.mxu1 %v2596_v21  ;;  %v2595_v6 = vld [vmem:[%s3691_s5 + $0x20] sm:$0xff]  }
 0x21a   :  { %1072 = vrot.lane.b32.xlu0 %v1036_v43, %s2641_s19  ;;  %2383 = vmatprep.subr.bf16.mxu1 %v2601_v22  ;;  %v2597_v43 = vld [vmem:[%s3691_s5 + $0x68] sm:$0xff]  }
 0x21b   :  { %v991_v35 = vpop.permute.xlu1 %990  ;;  %1074 = vrot.lane.b32.xlu1 %v1037_v31, %s2641_s19  ;;  %v989_v19 = vpop.permute.xlu0 %988  ;;  %2318 = vmatpush3.bf16.msra.mxu0 %v2590_v46  ;;  %v2598_v31 = vld [vmem:[%s3691_s5 + $0x28] sm:$0xff]  }
 0x21c   :  { %v1011_v7 = vsel %vm839_vm3, %v989_v19, %v991_v35  ;;  %v1038_v33 = vmax.f32 %v902_v11, %v989_v19  ;;  %2319 = vmatprep.subr.bf16.mxu0 %v2591_v37  ;;  %v2599_v11 = vld [vmem:[%s3691_s5 + $0x70] sm:$0xff]   ;;  %v2602_v35 = vld [vmem:[%s3691_s5 + $0x78] sm:$0xff]  }
 0x21d   :  { %v1039_v62 = vmax.f32 %v903_v52, %v1011_v7  ;;  %2384 = vmatpush3.bf16.msra.mxu1 %v2601_v22  ;;  %v2600_v52 = vld [vmem:[%s3691_s5 + $0x30] sm:$0xff]  }
 0x21e   :  { %1076 = vrot.lane.b32.xlu0 %v1038_v33, %s2641_s19 }
 0x21f   :  { %v995_v42 = vpop.permute.xlu1 %994  ;;  %1078 = vrot.lane.b32.xlu1 %v1039_v62, %s2641_s19  ;;  %v993_v4 = vpop.permute.xlu0 %992  ;;  %2320 = vmatpush3.bf16.msra.mxu0 %v2593_v28 }
 0x220   :  { %v1012_v2 = vsel %vm839_vm3, %v993_v4, %v995_v42  ;;  %v1040_v8 = vmax.f32 %v904_v38, %v993_v4  ;;  %2321 = vmatprep.subr.bf16.mxu0 %v2594_v39 }
 0x221   :  { %v1041_v18 = vmax.f32 %v905_v23, %v1012_v2 }
 0x222   :  { %1080 = vrot.lane.b32.xlu0 %v1040_v8, %s2641_s19 }
 0x223   :  { %v999_v20 = vpop.permute.xlu1 %998  ;;  %1082 = vrot.lane.b32.xlu1 %v1041_v18, %s2641_s19  ;;  %v997_v9 = vpop.permute.xlu0 %996  ;;  %2322 = vmatpush3.bf16.msra.mxu0 %v2595_v6  ;;  %v2605_v6 = vld [vmem:[%s3691_s5 + $0xa0] sm:$0xff]  }
 0x224   :  { %v1013_v15 = vsel %vm839_vm3, %v997_v9, %v999_v20  ;;  %v1042_v29 = vmax.f32 %v906_v44, %v997_v9  ;;  %2323 = vmatprep.subr.bf16.mxu0 %v2597_v43 }
 0x225   :  { %v1043_v47 = vmax.f32 %v907_v48, %v1013_v15 }
 0x226   :  { %1084 = vrot.lane.b32.xlu0 %v1042_v29, %s2641_s19 }
 0x227   :  { %v1003_v53 = vpop.permute.xlu1 %1002  ;;  %1086 = vrot.lane.b32.xlu1 %v1043_v47, %s2641_s19  ;;  %v1001_v5 = vpop.permute.xlu0 %1000  ;;  %2324 = vmatpush3.bf16.msra.mxu0 %v2598_v31 }
 0x228   :  { %v1014_v49 = vsel %vm839_vm3, %v1001_v5, %v1003_v53  ;;  %v1044_v40 = vmax.f32 %v908_v25, %v1001_v5  ;;  %2325 = vmatprep.subr.bf16.mxu0 %v2599_v11 }
 0x229   :  { %v1045_v57 = vmax.f32 %v909_v56, %v1014_v49  ;;  %v3402_v56 = vld [vmem:[%s3689_s3] ss:$0 sm:$0xff] }
 0x22a   :  { %1088 = vrot.lane.b32.xlu0 %v1044_v40, %s2641_s19 }
 0x22b   :  { %v1007_v60 = vpop.permute.xlu1 %1006  ;;  %1090 = vrot.lane.b32.xlu1 %v1045_v57, %s2641_s19  ;;  %v1005_v17 = vpop.permute.xlu0 %1004  ;;  %2326 = vmatpush3.bf16.msra.mxu0 %v2600_v52 }
 0x22c   :  { %v1015_v34 = vsel %vm839_vm3, %v1005_v17, %v1007_v60  ;;  %v1046_v61 = vmax.f32 %v910_v54, %v1005_v17  ;;  %2327 = vmatprep.subr.bf16.mxu0 %v2602_v35  ;;  %v3411_v54 = vld [vmem:[%s3690_s4] ss:$0 sm:$0xff]  ;;  %s2646_s4 = smov 80  }
 0x22d   :  { %v1047_v50 = vmax.f32 %v911_v12, %v1015_v34 }
 0x22e   :  { %1092 = vrot.lane.b32.xlu0 %v1046_v61, %s2641_s19  ;;  %v737_v61 = vmax.f32 %v3146_v32, %v3266_v55  ;;  %v2604_v32 = vld [vmem:[%s3691_s5 + $0x98] sm:$0xff]   ;;  %s2642_s5 = smov 96  }
 0x22f   :  { %1094 = vrot.lane.b32.xlu1 %v1047_v50, %s2641_s19  ;;  %v818_v19 = vpop.permute.xlu1 %817  ;;  %v816_v7 = vpop.permute.xlu0 %815  ;;  %2328 = vmatpush3.bf16.msra.mxu0 %v2603_v13 }
 0x230   :  { %v842_v17 = vsel %vm839_vm3, %v816_v7, %v818_v19  ;;  %2385 = vmatprep.subr.bf16.mxu1 %v2604_v32 }
 0x231   :  { %v858_v14 = vmax.f32 %v737_v61, %v842_v17  ;;  %2386 = vmatpush3.bf16.msra.mxu1 %v2604_v32 }
 0x232   :  { %2387 = vmatprep.subr.bf16.mxu1 %v2605_v6 }
 0x233   :  { %v822_v33 = vpop.permute.xlu1 %821  ;;  %v820_v62 = vpop.permute.xlu0 %819 }
 0x234   :  { %v843_v45 = vsel %vm839_vm3, %v820_v62, %v822_v33 }
 0x235   :  { %v859_v22 = vmax.f32 %v738_v10, %v843_v45  ;;  %2388 = vmatpush3.bf16.msra.mxu1 %v2605_v6 }
 0x237   :  { %v3386_v38 = vpop.permute.xlu1 %721  ;;  %v720_v23 = vpop.permute.xlu0 %719 }
 0x238   :  { %v739_v16 = vmax.f32 %v3225_v1, %v720_v23  ;;  %v740_v62 = vmax.f32 %v3228_v41, %v3386_v38 }
 0x23b   :  { %v826_v42 = vpop.permute.xlu1 %825  ;;  %v824_v4 = vpop.permute.xlu0 %823 }
 0x23c   :  { %v844_v37 = vsel %vm839_vm3, %v824_v4, %v826_v42 }
 0x23d   :  { %v860_v52 = vmax.f32 %v739_v16, %v844_v37 }
 0x23f   :  { %v830_v2 = vpop.permute.xlu1 %829  ;;  %v828_v8 = vpop.permute.xlu0 %827 }
 0x240   :  { %v845_v19 = vsel %vm839_vm3, %v828_v8, %v830_v2 }
 0x243   :  { %v3388_v18 = vpop.permute.xlu1 %725  ;;  %v3390_v44 = vpop.permute.xlu0 %723 }
 0x247   :  { %v3392_v48 = vpop.permute.xlu1 %833  ;;  %v832_v20 = vpop.permute.xlu0 %831 }
 0x248   :  { %v846_v2 = vsel %vm839_vm3, %v832_v20, %v3392_v48 }
 0x24b   :  { %v3394_v9 = vpop.permute.xlu1 %837  ;;  %v3396_v15 = vpop.permute.xlu0 %835 }
 0x27c   :  { %v1065_v29 = vpop.permute.xlu0 %1064 }
 0x27d   :  { %v1067_v47 = vpop.permute.xlu1 %1066 }
 0x27e   :  { %v1097_v25 = vsel %vm1096_vm4, %v1065_v29, %v1067_v47  ;;  %v861_v47 = vmax.f32 %v740_v62, %v845_v19 }
 0x27f   :  { %v1114_v53 = vsel %vm1113_vm5, %v3277_v36, %v1097_v25 }
 0x280   :  { %v1129_v40 = vmul.f32 %v3402_v56, %v1114_v53 }
 0x282   :  { %v1144_v36 = vadd.f32 %v3411_v54, %v1129_v40  ;;  %v741_v40 = vmax.f32 %v3247_v58, %v3390_v44 }
 0x284   :  { %v1069_v5 = vpop.permute.xlu0 %1068 }
 0x285   :  { %v1071_v49 = vpop.permute.xlu1 %1070 }
 0x286   :  { %v1098_v57 = vsel %vm1096_vm4, %v1069_v5, %v1071_v49 }
 0x287   :  { %v1115_v12 = vsel %vm1113_vm5, %v3288_v51, %v1098_v57 }
 0x288   :  { %v1130_v60 = vmul.f32 %v3402_v56, %v1115_v12 }
 0x28a   :  { %v1145_v34 = vadd.f32 %v3411_v54, %v1130_v60 }
 0x28c   :  { %v3421_v50 = vpack.c.bf16 %v1145_v34, %v1144_v36  ;;  %v1073_v63 = vpop.permute.xlu0 %1072  ;;  %v862_v36 = vmax.f32 %v741_v40, %v846_v2  ;;  %v847_v34 = vsel %vm839_vm3, %v3396_v15, %v3394_v9 }
 0x28d   :  { %v1075_v59 = vpop.permute.xlu1 %1074 }
 0x28e   :  { %v1099_v51 = vsel %vm1096_vm4, %v1073_v63, %v1075_v59  ;;  %v1159_v11 = vshll.u32 %v3421_v50, 16  ;;  %v1194_v25 = vrot.slane %v3421_v50, 1  ;;  %v1157_v53 = vshrl.u32 %v3421_v50, 16 }
 0x28f   :  { %v1116_v21 = vsel %vm1113_vm5, %v858_v14, %v1099_v51  ;;  %v742_v59 = vmax.f32 %v3250_v3, %v3388_v18 }
 0x290   :  { %v1077_v55 = vpop.permute.xlu0 %1076  ;;  %v1131_v28 = vmul.f32 %v3402_v56, %v1116_v21  ;;  %v1161_v29 = vrot.slane %v1159_v11, 1 }
 0x291   :  { %v1079_v46 = vpop.permute.xlu1 %1078  ;;  %v863_v51 = vmax.f32 %v742_v59, %v847_v34 }
 0x292   :  { %v1100_v30 = vsel %vm1096_vm4, %v1077_v55, %v1079_v46  ;;  %v1146_v7 = vadd.f32 %v3411_v54, %v1131_v28  ;;  %v1162_v60 = vor.u32 %v1161_v29, %v1157_v53 }
 0x293   :  { %v1117_v39 = vsel %vm1113_vm5, %v859_v22, %v1100_v30 }
 0x294   :  { %v1132_v43 = vmul.f32 %v3402_v56, %v1117_v39  ;;  %v1081_v31 = vpop.permute.xlu0 %1080 }
 0x295   :  { %v1083_v35 = vpop.permute.xlu1 %1082 }
 0x296   :  { %v1147_v1 = vadd.f32 %v3411_v54, %v1132_v43  ;;  %v1101_v33 = vsel %vm1096_vm4, %v1081_v31, %v1083_v35 }
 0x297   :  { %v1118_v23 = vsel %vm1113_vm5, %v860_v52, %v1101_v33 }
 0x298   :  { %v3451_v42 = vpack.c.bf16 %v1147_v1, %v1146_v7  ;;  %v1085_v4 = vpop.permute.xlu0 %1084  ;;  %v1133_v5 = vmul.f32 %v3402_v56, %v1118_v23 }
 0x299   :  { %v1087_v8 = vpop.permute.xlu1 %1086 }
 0x29a   :  { %v1102_v41 = vsel %vm1096_vm4, %v1085_v4, %v1087_v8  ;;  %v1195_v38 = vrot.slane %v3451_v42, 1  ;;  %v1164_v49 = vshll.u32 %v3451_v42, 16  ;;  %v1148_v58 = vadd.f32 %v3411_v54, %v1133_v5 }
 0x29b   :  { %v1119_v57 = vsel %vm1113_vm5, %v861_v47, %v1102_v41  ;;  %v1168_v21 = vshrl.u32 %v3451_v42, 16 }
 0x29c   :  { %v1134_v48 = vmul.f32 %v3402_v56, %v1119_v57  ;;  %v1089_v20 = vpop.permute.xlu0 %1088  ;;  %v1196_v12 = vsel %vm1193_vm6, %v1194_v25, %v1195_v38  ;;  %v1166_v17 = vrot.slane %v1164_v49, 1 }
 0x29d   :  { %v1091_v61 = vpop.permute.xlu1 %1090  ;;  %1215 = vrot.lane.b32.xlu1 %v1196_v12, %s2642_s5 }
 0x29e   :  { %v1149_v44 = vadd.f32 %v3411_v54, %v1134_v48  ;;  %v1103_v63 = vsel %vm1096_vm4, %v1089_v20, %v1091_v61  ;;  %v1167_v14 = vsel %vm76_vm0, %v1162_v60, %v1166_v17  ;;  %v1170_v37 = vor.u32 %v1168_v21, %v1166_v17  ;;  %v2267_v20 = vld [vmem:[%s3692_s6] ss:$0 sm:$0xff]  ;;  %s2644_s6 = smov 108  }
 0x29f   :  { %v1120_v45 = vsel %vm1113_vm5, %v862_v36, %v1103_v63  ;;  %1206 = vrot.lane.b32.xlu0 %v1167_v14, %s2643_s24 }
 0x2a0   :  { %v1154_v9 = vpack.c.bf16 %v1149_v44, %v1148_v58  ;;  %v1093_v15 = vpop.permute.xlu0 %1092  ;;  %v1135_v13 = vmul.f32 %v3402_v56, %v1120_v45 }
 0x2a1   :  { %v1095_v10 = vpop.permute.xlu1 %1094 }
 0x2a2   :  { %v1104_v32 = vsel %vm1096_vm4, %v1093_v15, %v1095_v10  ;;  %v1197_v55 = vrot.slane %v1154_v9, 1  ;;  %v1172_v22 = vshll.u32 %v1154_v9, 16  ;;  %v1150_v30 = vadd.f32 %v3411_v54, %v1135_v13 }
 0x2a3   :  { %v1121_v46 = vsel %vm1113_vm5, %v863_v51, %v1104_v32  ;;  %v1176_v31 = vshrl.u32 %v1154_v9, 16  ;;  %vm2143_vm4 = vcmask 195712   ;;  %vm2150_vm5 = vcmask 261312  }
 0x2a4   :  { %v1136_v3 = vmul.f32 %v3402_v56, %v1121_v46  ;;  %v1198_v18 = vsel %vm1193_vm6, %v1195_v38, %v1197_v55  ;;  %v1174_v28 = vrot.slane %v1172_v22, 1 }
 0x2a5   :  { %1217 = vrot.lane.b32.xlu1 %v1198_v18, %s2642_s5 }
 0x2a6   :  { %v1151_v16 = vadd.f32 %v3411_v54, %v1136_v3  ;;  %v1175_v39 = vsel %vm76_vm0, %v1170_v37, %v1174_v28  ;;  %v1178_v52 = vor.u32 %v1176_v31, %v1174_v28 }
 0x2a7   :  { %1208 = vrot.lane.b32.xlu0 %v1175_v39, %s2643_s24 }
 0x2a8   :  { %v1155_v6 = vpack.c.bf16 %v1151_v16, %v1150_v30 }
 0x2aa   :  { %v1199_v43 = vrot.slane %v1155_v6, 1  ;;  %v1180_v11 = vshll.u32 %v1155_v6, 16  ;;  %v1184_v19 = vshrl.u32 %v1155_v6, 16 }
 0x2ac   :  { %v1200_v56 = vsel %vm1193_vm6, %v1197_v55, %v1199_v43  ;;  %v1182_v35 = vrot.slane %v1180_v11, 1  ;;  %v1204_v54 = vsel %vm1193_vm6, %v1199_v43, 0 }
 0x2ad   :  { %1219 = vrot.lane.b32.xlu1 %v1200_v56, %s2642_s5 }
 0x2ae   :  { %v1183_v7 = vsel %vm76_vm0, %v1178_v52, %v1182_v35  ;;  %v1186_v1 = vor.u32 %v1184_v19, %v1182_v35 }
 0x2af   :  { %1210 = vrot.lane.b32.xlu0 %v1183_v7, %s2643_s24 }
 0x2b0   :  { %v1188_v33 = vsel %vm2946_vm2, %v1186_v1, 0 }
 0x2b1   :  { %1221 = vrot.lane.b32.xlu1 %v1204_v54, %s2642_s5 }
 0x2b3   :  { %1212 = vrot.lane.b32.xlu0 %v1188_v33, %s2643_s24 }
 0x30f   :  { %v1216_v62 = vpop.permute.xlu1 %1215 }
 0x310   :  { %2389 = vmatprep.mubr.msk.bf16.mxu1 %vm1424_vm7, %v1216_v62 }
 0x311   :  { %v1207_v23 = vpop.permute.xlu0 %1206 }
 0x312   :  { %v1225_v4 = vsel %vm1223_vm8, %v3421_v50, %v1207_v23  ;;  %v1238_v29 = vsel %vm1236_vm9, %v1207_v23, %v1216_v62 }
 0x313   :  { %1465 = vmatprep.mubr.bf16.mxu0 %v1238_v29 }
 0x314   :  { %1466 = vmatmul.mubr.bf16.vlgmr.msra.gmra.mrb[16].mxu0 %v1225_v4 }
 0x317   :  { %v1218_v47 = vpop.permute.xlu1 %1217 }
 0x318   :  { %2390 = vmatmul.mubr.msk.bf16.vlgmr.msra.gmra.mrb[16].mxu1 %vm1424_vm7, %v1218_v47 }
 0x319   :  { %v1209_v2 = vpop.permute.xlu0 %1208 }
 0x31a   :  { %v1241_v8 = vsel %vm1236_vm9, %v1209_v2, %v1218_v47  ;;  %v1228_v25 = vsel %vm1223_vm8, %v3451_v42, %v1209_v2 }
 0x31b   :  { %1473 = vmatprep.mubr.bf16.mxu0 %v1241_v8 }
 0x31c   :  { %1474 = vmatmul.mubr.bf16.gmra.mrb[20].mxu0 %v1228_v25 }
 0x31f   :  { %v1220_v53 = vpop.permute.xlu1 %1219 }
 0x320   :  { %2393 = vmatprep.mubr.msk.bf16.mxu1 %vm1424_vm7, %v1220_v53 }
 0x321   :  { %v1211_v5 = vpop.permute.xlu0 %1210 }
 0x322   :  { %v1244_v50 = vsel %vm1236_vm9, %v1211_v5, %v1220_v53  ;;  %v1231_v41 = vsel %vm1223_vm8, %v1154_v9, %v1211_v5 }
 0x323   :  { %v1222_v38 = vpop.permute.xlu1 %1221  ;;  %1481 = vmatprep.mubr.bf16.mxu0 %v1244_v50 }
 0x324   :  { %1482 = vmatmul.mubr.bf16.gmra.mrb[24].mxu0 %v1231_v41  ;;  %2394 = vmatmul.mubr.msk.bf16.gmra.mrb[20].mxu1 %vm1424_vm7, %v1222_v38 }
 0x325   :  { %v1213_v49 = vpop.permute.xlu0 %1212 }
 0x326   :  { %v1247_v40 = vsel %vm1236_vm9, %v1213_v49, %v1222_v38  ;;  %v1234_v42 = vsel %vm1223_vm8, %v1155_v6, %v1213_v49  ;;  %vm2171_vm8 = vcmask 458112   ;;  %vm2178_vm9 = vcmask 523712  }
 0x327   :  { %1489 = vmatprep.mubr.bf16.mxu0 %v1247_v40 }
 0x32c   :  { %1490 = vmatmul.mubr.bf16.gmra.mrb[28].mxu0 %v1234_v42 }
 0x3e7   :  { %v2329_v57 = vpop.f32.mrb[16].mxu0 }
 0x3e8   :  { %v2330_v48 = vpop.f32.mrb[17].mxu0 }
 0x3e9   :  { %v2331_v12 = vadd.f32 %v2330_v48, %v2329_v57  ;;  %v2332_v60 = vpop.f32.mrb[18].mxu0 }
 0x3ea   :  { %v2333_v17 = vpop.f32.mrb[19].mxu0 }
 0x3eb   :  { %v2334_v36 = vadd.f32 %v2333_v17, %v2332_v60  ;;  %v2391_v34 = vpop.f32.mrb[16].mxu1  ;;  %v1468_v61 = vadd.f32 %v2331_v12, %v2267_v20 }
 0x3ec   :  { %v1532_v58 = vpop.f32.mrb[17].mxu1 }
 0x3ed   :  { %v1533_v44 = vadd.f32 %v1532_v58, %v1468_v61  ;;  %v2392_v63 = vpop.f32.mrb[18].mxu1  ;;  %v1471_v14 = vadd.f32 %v2334_v36, %v2267_v20 }
 0x3ee   :  { %v1535_v59 = vpop.f32.mrb[19].mxu1 }
 0x3ef   :  { %v1536_v45 = vadd.f32 %v1535_v59, %v1471_v14  ;;  %v2335_v9 = vpop.f32.mrb[20].mxu0  ;;  %v1563_v51 = vmax.f32 %v1533_v44, 0.0 }
 0x3f0   :  { %v2336_v15 = vpop.f32.mrb[21].mxu0 }
 0x3f1   :  { %v1564_v10 = vmax.f32 %v1536_v45, 0.0  ;;  %v2337_v21 = vadd.f32 %v2336_v15, %v2335_v9  ;;  %v2338_v13 = vpop.f32.mrb[22].mxu0 }
 0x3f2   :  { %v2339_v32 = vpop.f32.mrb[23].mxu0 }
 0x3f3   :  { %v2444_v55 = vpack.i.bf16 %v1564_v10, %v1563_v51  ;;  %v1476_v22 = vadd.f32 %v2337_v21, %v2267_v20  ;;  %v2340_v46 = vadd.f32 %v2339_v32, %v2338_v13 }
 0x3f5   :  { %v1541_v3 = vadd.f32 %v2391_v34, %v1476_v22  ;;  %v1479_v18 = vadd.f32 %v2340_v46, %v2267_v20  ;;  %2445 = vrot.lane.b32.xlu0 %v2444_v55, %s2644_s6 }
 0x3f7   :  { %v1544_v37 = vadd.f32 %v2392_v63, %v1479_v18  ;;  %v2341_v28 = vpop.f32.mrb[24].mxu0  ;;  %v2395_v30 = vpop.f32.mrb[20].mxu1  ;;  %v1565_v6 = vmax.f32 %v1541_v3, 0.0  ;;  %v2606_v3 = vld [vmem:[%s3693_s7] sm:$0xff]   ;;  %v2607_v18 = vld [vmem:[%s3693_s7 + $0x8] sm:$0xff]  }
 0x3f8   :  { %v2342_v16 = vpop.f32.mrb[25].mxu0  ;;  %v1548_v39 = vpop.f32.mrb[21].mxu1  ;;  %2397 = vmatprep.subr.bf16.mxu1 %v2606_v3 }
 0x3f9   :  { %v1566_v43 = vmax.f32 %v1544_v37, 0.0  ;;  %v2343_v31 = vadd.f32 %v2342_v16, %v2341_v28  ;;  %v2344_v11 = vpop.f32.mrb[26].mxu0  ;;  %v2396_v56 = vpop.f32.mrb[22].mxu1  ;;  %2398 = vmatpush3.bf16.msra.mxu1 %v2606_v3 }
 0x3fa   :  { %v2345_v52 = vpop.f32.mrb[27].mxu0  ;;  %v1551_v35 = vpop.f32.mrb[23].mxu1  ;;  %2399 = vmatprep.subr.bf16.mxu1 %v2607_v18 }
 0x3fb   :  { %v1484_v19 = vadd.f32 %v2343_v31, %v2267_v20  ;;  %v2346_v7 = vadd.f32 %v2345_v52, %v2344_v11  ;;  %v2449_v1 = vpack.i.bf16 %v1566_v43, %v1565_v6  ;;  %v2609_v11 = vld [vmem:[%s3693_s7 + $0x18] sm:$0xff]  }
 0x3fd   :  { %v1549_v54 = vadd.f32 %v1548_v39, %v1484_v19  ;;  %v1487_v33 = vadd.f32 %v2346_v7, %v2267_v20  ;;  %2450 = vrot.lane.b32.xlu1 %v2449_v1, %s2644_s6  ;;  %2400 = vmatpush3.bf16.msra.mxu1 %v2607_v18 }
 0x3ff   :  { %v1552_v62 = vadd.f32 %v1551_v35, %v1487_v33  ;;  %v2347_v23 = vpop.f32.mrb[28].mxu0  ;;  %v1567_v29 = vmax.f32 %v1549_v54, 0.0  ;;  %v2610_v54 = vld [vmem:[%s3693_s7 + $0x20] sm:$0xff]  }
 0x400   :  { %v2348_v4 = vpop.f32.mrb[29].mxu0 }
 0x401   :  { %v1568_v47 = vmax.f32 %v1552_v62, 0.0  ;;  %v2349_v2 = vadd.f32 %v2348_v4, %v2347_v23  ;;  %v2350_v8 = vpop.f32.mrb[30].mxu0 }
 0x402   :  { %v2351_v25 = vpop.f32.mrb[31].mxu0 }
 0x403   :  { %v2454_v53 = vpack.i.bf16 %v1568_v47, %v1567_v29  ;;  %v1492_v5 = vadd.f32 %v2349_v2, %v2267_v20  ;;  %v2352_v50 = vadd.f32 %v2351_v25, %v2350_v8 }
 0x405   :  { %v1557_v41 = vadd.f32 %v2395_v30, %v1492_v5  ;;  %v1495_v38 = vadd.f32 %v2352_v50, %v2267_v20  ;;  %2455 = vrot.lane.b32.xlu0 %v2454_v53, %s2644_s6  ;;  %v2611_v5 = vld [vmem:[%s3693_s7 + $0x28] sm:$0xff]  }
 0x407   :  { %v1560_v49 = vadd.f32 %v2396_v56, %v1495_v38  ;;  %v1569_v40 = vmax.f32 %v1557_v41, 0.0 }
 0x409   :  { %v1570_v42 = vmax.f32 %v1560_v49, 0.0 }
 0x40b   :  { %v2459_v57 = vpack.i.bf16 %v1570_v42, %v1569_v40 }
 0x40d   :  { %2460 = vrot.lane.b32.xlu1 %v2459_v57, %s2644_s6 }
 0x467   :  { %v2446_v48 = vpop.permute.xlu0 %2445 }
 0x468   :  { %v2448_v12 = vunpack.i.h.bf16 %v2446_v48  ;;  %v2447_v60 = vunpack.i.l.bf16 %v2446_v48 }
 0x46a   :  { %v1604_v17 = vmax.f32 %v1564_v10, %v2448_v12  ;;  %v1603_v36 = vmax.f32 %v1563_v51, %v2447_v60 }
 0x46c   :  { %v2464_v34 = vpack.i.bf16 %v1604_v17, %v1603_v36 }
 0x46e   :  { %2465 = vrot.lane.b32.xlu0 %v2464_v34, %s2641_s19 }
 0x46f   :  { %v2451_v61 = vpop.permute.xlu1 %2450 }
 0x470   :  { %v2453_v58 = vunpack.i.h.bf16 %v2451_v61  ;;  %v2452_v44 = vunpack.i.l.bf16 %v2451_v61 }
 0x472   :  { %v1606_v20 = vmax.f32 %v1566_v43, %v2453_v58  ;;  %v1605_v63 = vmax.f32 %v1565_v6, %v2452_v44  ;;  %v2608_v6 = vld [vmem:[%s3693_s7 + $0x10] sm:$0xff]  }
 0x473   :  { %2401 = vmatprep.subr.bf16.mxu1 %v2608_v6 }
 0x474   :  { %v2469_v14 = vpack.i.bf16 %v1606_v20, %v1605_v63  ;;  %2402 = vmatpush3.bf16.msra.mxu1 %v2608_v6 }
 0x475   :  { %2403 = vmatprep.subr.bf16.mxu1 %v2609_v11 }
 0x476   :  { %2470 = vrot.lane.b32.xlu1 %v2469_v14, %s2641_s19 }
 0x477   :  { %v2456_v59 = vpop.permute.xlu0 %2455 }
 0x478   :  { %v2458_v45 = vunpack.i.h.bf16 %v2456_v59  ;;  %v2457_v9 = vunpack.i.l.bf16 %v2456_v59  ;;  %2404 = vmatpush3.bf16.msra.mxu1 %v2609_v11 }
 0x479   :  { %2405 = vmatprep.subr.bf16.mxu1 %v2610_v54 }
 0x47a   :  { %v1608_v15 = vmax.f32 %v1568_v47, %v2458_v45  ;;  %v1607_v21 = vmax.f32 %v1567_v29, %v2457_v9 }
 0x47c   :  { %v2474_v13 = vpack.i.bf16 %v1608_v15, %v1607_v21  ;;  %2406 = vmatpush3.bf16.msra.mxu1 %v2610_v54 }
 0x47d   :  { %2407 = vmatprep.subr.bf16.mxu1 %v2611_v5 }
 0x47e   :  { %2475 = vrot.lane.b32.xlu0 %v2474_v13, %s2641_s19 }
 0x47f   :  { %v2461_v51 = vpop.permute.xlu1 %2460 }
 0x480   :  { %v2463_v10 = vunpack.i.h.bf16 %v2461_v51  ;;  %v2462_v32 = vunpack.i.l.bf16 %v2461_v51  ;;  %2408 = vmatpush3.bf16.msra.mxu1 %v2611_v5 }
 0x482   :  { %v3522_v55 = vmax.f32 %v1570_v42, %v2463_v10  ;;  %v3524_v22 = vmax.f32 %v1569_v40, %v2462_v32 }
 0x484   :  { %v2479_v46 = vpack.i.bf16 %v3522_v55, %v3524_v22 }
 0x486   :  { %2480 = vrot.lane.b32.xlu1 %v2479_v46, %s2641_s19 }
 0x4e0   :  { %v2466_v37 = vpop.permute.xlu0 %2465 }
 0x4e1   :  { %v2468_v28 = vunpack.i.h.bf16 %v2466_v37  ;;  %v2467_v30 = vunpack.i.l.bf16 %v2466_v37 }
 0x4e3   :  { %v1644_v16 = vmax.f32 %v1604_v17, %v2468_v28  ;;  %v1643_v39 = vmax.f32 %v1603_v36, %v2467_v30  ;;  %v2612_v17 = vld [vmem:[%s3693_s7 + $0x30] ss:$0 sps:$4 sm:$0x33]   ;;  %s2647_s7 = smov 20  }
 0x4e4   :  { %2431 = vmatprep.subr.msk.bf16.mxu1 %vm1870_vm11, %v2612_v17  ;;  %v1872_v59 = vsel %vm1870_vm11, %v2612_v17, 0 }
 0x4e5   :  { %v3538_v43 = vpack.c.bf16 %v1644_v16, %v1643_v39  ;;  %2410 = vmatpush3.bf16.msra.mxu1 %v1872_v59 }
 0x4e7   :  { %v1658_v7 = vshll.u32 %v3538_v43, 16  ;;  %v1692_v33 = vrot.slane %v3538_v43, 1  ;;  %v1656_v50 = vshrl.u32 %v3538_v43, 16  ;;  %v1721_v49 = vrot.slane %v3538_v43, 2 }
 0x4e8   :  { %v2471_v31 = vpop.permute.xlu1 %2470 }
 0x4e9   :  { %v2473_v56 = vunpack.i.h.bf16 %v2471_v31  ;;  %v2472_v52 = vunpack.i.l.bf16 %v2471_v31  ;;  %v1660_v29 = vrot.slane %v1658_v7, 1  ;;  %v1702_v36 = vrot.slane %v1656_v50, 1 }
 0x4ea   :  { %v1703_v34 = vrot.slane %v1658_v7, 2 }
 0x4eb   :  { %v1646_v35 = vmax.f32 %v1606_v20, %v2473_v56  ;;  %v1645_v19 = vmax.f32 %v1605_v63, %v2472_v52  ;;  %v1661_v60 = vor.u32 %v1660_v29, %v1656_v50  ;;  %v2613_v29 = vld [vmem:[%s3695_s9] sm:$0xff]  }
 0x4ec   :  { %v1704_v13 = vor.u32 %v1703_v34, %v1702_v36  ;;  %2419 = vmatprep.subr.bf16.mxu0 %v2613_v29 }
 0x4ed   :  { %v3544_v1 = vpack.c.bf16 %v1646_v35, %v1645_v19  ;;  %2420 = vmatpush3.bf16.msra.mxu0 %v2613_v29 }
 0x4ef   :  { %v1693_v62 = vrot.slane %v3544_v1, 1  ;;  %v1663_v23 = vshll.u32 %v3544_v1, 16  ;;  %v1667_v47 = vshrl.u32 %v3544_v1, 16  ;;  %v1722_v53 = vrot.slane %v3544_v1, 2 }
 0x4f0   :  { %v2476_v4 = vpop.permute.xlu0 %2475 }
 0x4f1   :  { %v2478_v2 = vunpack.i.h.bf16 %v2476_v4  ;;  %v2477_v8 = vunpack.i.l.bf16 %v2476_v4  ;;  %v1694_v25 = vsel %vm1193_vm6, %v1692_v33, %v1693_v62  ;;  %v1665_v40 = vrot.slane %v1663_v23, 1 }
 0x4f2   :  { %1741 = vrot.lane.b32.xlu0 %v1694_v25, %s2645_s2  ;;  %v1705_v42 = vrot.slane %v1667_v47, 1  ;;  %v1706_v57 = vrot.slane %v1663_v23, 2  ;;  %v1723_v12 = vsel %vm1720_vm10, %v1721_v49, %v1722_v53 }
 0x4f3   :  { %v1648_v41 = vmax.f32 %v1608_v15, %v2478_v2  ;;  %v1647_v38 = vmax.f32 %v1607_v21, %v2477_v8  ;;  %v1666_v58 = vsel %vm76_vm0, %v1661_v60, %v1665_v40  ;;  %v1669_v30 = vor.u32 %v1667_v47, %v1665_v40 }
 0x4f4   :  { %v1707_v63 = vor.u32 %v1706_v57, %v1705_v42 }
 0x4f5   :  { %v3561_v48 = vpack.c.bf16 %v1648_v41, %v1647_v38 }
 0x4f6   :  { %1759 = vrot.lane.b32.xlu0 %v1723_v12, %s2646_s4  ;;  %v1708_v32 = vsel %vm1701_vm12, %v1704_v13, %v1707_v63 }
 0x4f7   :  { %v1695_v61 = vrot.slane %v3561_v48, 1  ;;  %v1724_v20 = vrot.slane %v3561_v48, 2  ;;  %v1671_v14 = vshll.u32 %v3561_v48, 16  ;;  %v1675_v21 = vshrl.u32 %v3561_v48, 16 }
 0x4f8   :  { %v2481_v44 = vpop.permute.xlu1 %2480 }
 0x4f9   :  { %v2483_v45 = vunpack.i.h.bf16 %v2481_v44  ;;  %v2482_v9 = vunpack.i.l.bf16 %v2481_v44  ;;  %v1696_v15 = vsel %vm1193_vm6, %v1693_v62, %v1695_v61  ;;  %v1673_v46 = vrot.slane %v1671_v14, 1 }
 0x4fa   :  { %1743 = vrot.lane.b32.xlu1 %v1696_v15, %s2645_s2  ;;  %1732 = vrot.lane.b32.xlu0 %v1666_v58, %s2647_s7  ;;  %v1725_v18 = vsel %vm1720_vm10, %v1722_v53, %v1724_v20  ;;  %v1709_v37 = vrot.slane %v1675_v21, 1  ;;  %v1710_v28 = vrot.slane %v1671_v14, 2 }
 0x4fb   :  { %v1650_v51 = vmax.f32 %v3522_v55, %v2483_v45  ;;  %v1649_v10 = vmax.f32 %v3524_v22, %v2482_v9  ;;  %v1674_v39 = vsel %vm76_vm0, %v1669_v30, %v1673_v46  ;;  %v1677_v35 = vor.u32 %v1675_v21, %v1673_v46  ;;  %v2293_v46 = vld [vmem:[%s3694_s8] ss:$0 sm:$0xff] }
 0x4fc   :  { %v1711_v31 = vor.u32 %v1710_v28, %v1709_v37 }
 0x4fd   :  { %v3579_v3 = vpack.c.bf16 %v1650_v51, %v1649_v10 }
 0x4fe   :  { %1761 = vrot.lane.b32.xlu1 %v1725_v18, %s2646_s4  ;;  %1750 = vrot.lane.b32.xlu0 %v1708_v32, %s2648_s20  ;;  %v1712_v19 = vsel %vm1701_vm12, %v1707_v63, %v1711_v31  ;;  %v2614_v32 = vld [vmem:[%s3695_s9 + $0x8] sm:$0xff]  }
 0x4ff   :  { %v1697_v16 = vrot.slane %v3579_v3, 1  ;;  %v1679_v55 = vshll.u32 %v3579_v3, 16  ;;  %v1683_v22 = vshrl.u32 %v3579_v3, 16  ;;  %v1726_v4 = vrot.slane %v3579_v3, 2  ;;  %2421 = vmatprep.subr.bf16.mxu0 %v2614_v32 }
 0x500   :  { %2422 = vmatpush3.bf16.msra.mxu0 %v2614_v32 }
 0x501   :  { %v1698_v6 = vsel %vm1193_vm6, %v1695_v61, %v1697_v16  ;;  %v1681_v11 = vrot.slane %v1679_v55, 1  ;;  %v1713_v56 = vrot.slane %v1683_v22, 1  ;;  %v1714_v52 = vrot.slane %v1679_v55, 2 }
 0x502   :  { %1734 = vrot.lane.b32.xlu1 %v1674_v39, %s2647_s7  ;;  %1745 = vrot.lane.b32.xlu0 %v1698_v6, %s2645_s2  ;;  %v1700_v33 = vsel %vm1193_vm6, %v1697_v16, 0  ;;  %v1727_v2 = vsel %vm1720_vm10, %v1724_v20, %v1726_v4  ;;  %v1730_v25 = vsel %vm1720_vm10, %v1726_v4, 0  ;;  %vm2157_vm6 = vcmask 326912  }
 0x503   :  { %v1682_v7 = vsel %vm76_vm0, %v1677_v35, %v1681_v11  ;;  %v1715_v54 = vor.u32 %v1714_v52, %v1713_v56  ;;  %v1685_v23 = vor.u32 %v1683_v22, %v1681_v11  ;;  %vm1785_vm0 = vcmask 490496  }
 0x504   :  { %vm2181_vm10 = vcmask 516096  }
 0x505   :  { %v1716_v62 = vsel %vm1701_vm12, %v1711_v31, %v1715_v54  ;;  %v1687_v47 = vsel %vm2946_vm2, %v1685_v23, 0  ;;  %v1719_v8 = vsel %vm1718_vm13, %v1715_v54, 0  ;;  %vm1974_vm2 = vcmask 261120  }
 0x506   :  { %1752 = vrot.lane.b32.xlu1 %v1712_v19, %s2648_s20  ;;  %1736 = vrot.lane.b32.xlu0 %v1682_v7, %s2647_s7 }
 0x50a   :  { %1747 = vrot.lane.b32.xlu1 %v1700_v33, %s2645_s2  ;;  %1754 = vrot.lane.b32.xlu0 %v1716_v62, %s2648_s20 }
 0x50e   :  { %1738 = vrot.lane.b32.xlu1 %v1687_v47, %s2647_s7  ;;  %1763 = vrot.lane.b32.xlu0 %v1727_v2, %s2646_s4 }
 0x512   :  { %1756 = vrot.lane.b32.xlu1 %v1719_v8, %s2648_s20 }
 0x516   :  { %1765 = vrot.lane.b32.xlu1 %v1730_v25, %s2646_s4 }
 0x564   :  { %v1742_v53 = vpop.permute.xlu0 %1741 }
 0x568   :  { %v1760_v24 = vpop.permute.xlu0 %1759 }
 0x56c   :  { %v1744_v5 = vpop.permute.xlu1 %1743  ;;  %v1733_v50 = vpop.permute.xlu0 %1732 }
 0x56d   :  { %v1769_v41 = vsel %vm1767_vm14, %v3538_v43, %v1733_v50 }
 0x56e   :  { %v1778_v49 = vsel %vm1776_vm15, %v1769_v41, %v1742_v53 }
 0x570   :  { %v1762_v38 = vpop.permute.xlu1 %1761  ;;  %v1751_v40 = vpop.permute.xlu0 %1750 }
 0x571   :  { %v1787_v42 = vsel %vm1785_vm0, %v1778_v49, %v1751_v40  ;;  %v2312_v49 = vld [vmem:[%s3697_s11] ss:$0 sm:$0xff] }
 0x572   :  { %v1795_v57 = vsel %vm1424_vm7, %v1787_v42, %v1760_v24  ;;  %v2649_v24 = vmov 0  }
 0x573   :  { %2411 = vmatprep.mubr.msk.bf16.mxu1 %vm1861_vm1, %v1795_v57  ;;  %2484 = vset.pattern.permute.xlu0 %v2649_v24 }
 0x574   :  { %v1735_v12 = vpop.permute.xlu1 %1734  ;;  %v1746_v60 = vpop.permute.xlu0 %1745 }
 0x575   :  { %v1771_v17 = vsel %vm1767_vm14, %v3544_v1, %v1735_v12 }
 0x576   :  { %v1780_v43 = vsel %vm1776_vm15, %v1771_v17, %v1744_v5  ;;  %v2305_v5 = vld [vmem:[%s3696_s10] ss:$0 sm:$0xff]  ;;  %s2650_s10 = smov [#allocation3]  }
 0x577   :  { %s2189_s11 = sshll.u32 %s2650_s10, 4  ;;  %s2190_s11 = int_to_ptr.vmem [resolvable:$true] %s2189_s11 }
 0x578   :  { %v1753_v36 = vpop.permute.xlu1 %1752  ;;  %v1737_v34 = vpop.permute.xlu0 %1736  ;;  %s2615_s27 = scalar_lea.vmem %s2190_s11, 16  ;;  %s2619_s28 = scalar_lea.vmem %s2190_s11, 32 }
 0x579   :  { %v1789_v61 = vsel %vm1785_vm0, %v1780_v43, %v1753_v36  ;;  %v1773_v44 = vsel %vm1767_vm14, %v3561_v48, %v1737_v34  ;;  %p2616_p0 = scmp.ne.s32.totalorder %s2190_s11, %s2615_s27  ;;  %p2620_p1 = scmp.lt.s32.totalorder %s2190_s11, %s2190_s11 }
 0x57a   :  { %v1797_v58 = vsel %vm1424_vm7, %v1789_v61, %v1762_v38  ;;  %v1782_v14 = vsel %vm1776_vm15, %v1773_v44, %v1746_v60  ;;  %p2621_p2 = scmp.lt.s32.totalorder %s2619_s28, %s2615_s27 }
 0x57b   :  { %2412 = vmatmul.mubr.msk.bf16.vlgmr.msra.gmra.mrb[24].mxu1 %vm1861_vm1, %v1797_v58 }
 0x57c   :  { %v1748_v20 = vpop.permute.xlu1 %1747  ;;  %v1755_v63 = vpop.permute.xlu0 %1754  ;;  %p2622_p3 = por %p2621_p2, %p2620_p1 }
 0x57d   :  { %v1791_v59 = vsel %vm1785_vm0, %v1782_v14, %v1755_v63 }
 0x57e   :  { %p2623_p4 = pnand %p2622_p3, %p2616_p0 }
 0x580   :  { %v1739_v1 = vpop.permute.xlu1 %1738  ;;  %v1764_v45 = vpop.permute.xlu0 %1763 }
 0x581   :  { %v1799_v9 = vsel %vm1424_vm7, %v1791_v59, %v1764_v45  ;;  %v1775_v15 = vsel %vm1767_vm14, %v3579_v3, %v1739_v1 }
 0x582   :  { %2415 = vmatprep.mubr.msk.bf16.mxu1 %vm1861_vm1, %v1799_v9  ;;  %v1784_v13 = vsel %vm1776_vm15, %v1775_v15, %v1748_v20 }
 0x584   :  { %v1757_v21 = vpop.permute.xlu1 %1756 }
 0x585   :  { %v1793_v48 = vsel %vm1785_vm0, %v1784_v13, %v1757_v21 }
 0x588   :  { %v1766_v51 = vpop.permute.xlu1 %1765 }
 0x589   :  { %v1801_v10 = vsel %vm1424_vm7, %v1793_v48, %v1766_v51  ;;  %vm2164_vm7 = vcmask 392512  }
 0x58a   :  { %2416 = vmatmul.mubr.msk.bf16.gmra.mrb[28].mxu1 %vm1861_vm1, %v1801_v10 }
 0x64e   :  { %v2413_v3 = vpop.f32.mrb[24].mxu1 }
 0x64f   :  { %v1917_v18 = vadd.f32 %v2413_v3, %v2293_v46  ;;  %v1908_v37 = vpop.f32.mrb[25].mxu1 }
 0x650   :  { %v1909_v28 = vadd.f32 %v2293_v46, %v1908_v37  ;;  %v2414_v30 = vpop.f32.mrb[26].mxu1 }
 0x651   :  { %v1920_v16 = vadd.f32 %v2414_v30, %v2293_v46  ;;  %v1911_v55 = vpop.f32.mrb[27].mxu1  ;;  %v1941_v39 = vmax.f32 %v1917_v18, 0.0 }
 0x652   :  { %v1912_v22 = vadd.f32 %v2293_v46, %v1911_v55  ;;  %v1939_v31 = vmax.f32 %v1909_v28, 0.0 }
 0x653   :  { %v1942_v6 = vmax.f32 %v1920_v16, 0.0 }
 0x654   :  { %v1940_v11 = vmax.f32 %v1912_v22, 0.0 }
 0x655   :  { %v1948_v56 = vpack.c.bf16 %v1942_v6, %v1941_v39 }
 0x656   :  { %v1947_v52 = vpack.c.bf16 %v1940_v11, %v1939_v31  ;;  %v2099_v31 = vld [vmem:[#allocation2] sm:$0x1] }
 0x658   :  { %2423 = vmatprep.mubr.msk.bf16.mxu0 %vm1974_vm2, %v1947_v52 }
 0x659   :  { %2424 = vmatmul.mubr.msk.bf16.vlgmr.msra.gmra.mrb[32].mxu0 %vm1974_vm2, %v1948_v56 }
 0x65d   :  { %v2417_v35 = vpop.f32.mrb[28].mxu1 }
 0x65e   :  { %v1933_v19 = vadd.f32 %v2417_v35, %v2293_v46  ;;  %v1924_v7 = vpop.f32.mrb[29].mxu1 }
 0x65f   :  { %v1925_v54 = vadd.f32 %v2293_v46, %v1924_v7  ;;  %v2418_v33 = vpop.f32.mrb[30].mxu1 }
 0x660   :  { %v1936_v62 = vadd.f32 %v2418_v33, %v2293_v46  ;;  %v1927_v23 = vpop.f32.mrb[31].mxu1  ;;  %v1945_v29 = vmax.f32 %v1933_v19, 0.0  ;;  %v2126_v19 = vand.u32 127, %v185_v26 }
 0x661   :  { %v1928_v4 = vadd.f32 %v2293_v46, %v1927_v23  ;;  %v1943_v2 = vmax.f32 %v1925_v54, 0.0 }
 0x662   :  { %v1946_v47 = vmax.f32 %v1936_v62, 0.0  ;;  %v2131_v33 = vadd.s32 4294967288, %v2126_v19  ;;  %v2138_v62 = vadd.s32 4294967280, %v2126_v19  ;;  %v2145_v23 = vadd.s32 4294967272, %v2126_v19 }
 0x663   :  { %v1944_v8 = vmax.f32 %v1928_v4, 0.0 }
 0x664   :  { %v1950_v25 = vpack.c.bf16 %v1946_v47, %v1945_v29  ;;  %v2152_v47 = vadd.s32 4294967264, %v2126_v19  ;;  %v2141_v24 = vsub.s32 %v2138_v62, %v2957_v27  ;;  %v2148_v26 = vsub.s32 %v2145_v23, %v2957_v27 }
 0x665   :  { %v1949_v53 = vpack.c.bf16 %v1944_v8, %v1943_v2  ;;  %v2159_v2 = vadd.s32 4294967256, %v2126_v19 }
 0x667   :  { %2427 = vmatprep.mubr.msk.bf16.mxu0 %vm1974_vm2, %v1949_v53  ;;  %v2134_v53 = vsub.s32 %v2131_v33, %v2957_v27 }
 0x668   :  { %2428 = vmatmul.mubr.msk.bf16.gmra.mrb[36].mxu0 %vm1974_vm2, %v1950_v25  ;;  %v2129_v25 = vsub.s32 %v2126_v19, %v2957_v27 }
 0x72c   :  { %v2425_v50 = vpop.f32.mrb[32].mxu0 }
 0x72d   :  { %v2030_v41 = vadd.f32 %v2425_v50, %v2305_v5  ;;  %v2021_v38 = vpop.f32.mrb[33].mxu0  ;;  %v2173_v50 = vadd.s32 4294967240, %v2126_v19 }
 0x72e   :  { %v2022_v40 = vadd.f32 %v2305_v5, %v2021_v38  ;;  %v2426_v42 = vpop.f32.mrb[34].mxu0 }
 0x72f   :  { %v2054_v57 = vmax.f32 %v2030_v41, 0.0  ;;  %v2033_v12 = vadd.f32 %v2426_v42, %v2305_v5  ;;  %v2024_v60 = vpop.f32.mrb[35].mxu0 }
 0x730   :  { %v2052_v17 = vmax.f32 %v2022_v40, 0.0  ;;  %v2025_v43 = vadd.f32 %v2305_v5, %v2024_v60 }
 0x731   :  { %v2069_v36 = vmul.f32 %v2312_v49, %v2054_v57  ;;  %v2055_v58 = vmax.f32 %v2033_v12, 0.0  ;;  %v2155_v57 = vsub.s32 %v2152_v47, %v2957_v27 }
 0x732   :  { %v2053_v34 = vmax.f32 %v2025_v43, 0.0  ;;  %v2067_v61 = vmul.f32 %v2312_v49, %v2052_v17 }
 0x733   :  { %v2081_v44 = vsel %vm839_vm3, %v2069_v36, 0.0  ;;  %v2070_v14 = vmul.f32 %v2312_v49, %v2055_v58  ;;  %v2176_v58 = vsub.s32 %v2173_v50, %v2957_v27 }
 0x734   :  { %v2068_v20 = vmul.f32 %v2312_v49, %v2053_v34  ;;  %2082 = vadd.xlane.f32.xlu0 %v2081_v44  ;;  %v2075_v59 = vsel %vm839_vm3, %v2067_v61, 0.0 }
 0x735   :  { %v2084_v45 = vsel %vm839_vm3, %v2070_v14, 0.0 }
 0x736   :  { %v2078_v63 = vsel %vm839_vm3, %v2068_v20, 0.0 }
 0x737   :  { %2079 = vadd.xlane.f32.xlu1 %v2078_v63 }
 0x738   :  { %2076 = vadd.xlane.f32.xlu0 %v2075_v59 }
 0x73b   :  { %v2429_v1 = vpop.f32.mrb[36].mxu0 }
 0x73c   :  { %v2046_v9 = vadd.f32 %v2429_v1, %v2305_v5  ;;  %2085 = vadd.xlane.f32.xlu0 %v2084_v45  ;;  %v2037_v15 = vpop.f32.mrb[37].mxu0 }
 0x73d   :  { %v2038_v21 = vadd.f32 %v2305_v5, %v2037_v15  ;;  %v2430_v13 = vpop.f32.mrb[38].mxu0 }
 0x73e   :  { %v2058_v48 = vmax.f32 %v2046_v9, 0.0  ;;  %v2049_v51 = vadd.f32 %v2430_v13, %v2305_v5  ;;  %v2040_v10 = vpop.f32.mrb[39].mxu0 }
 0x73f   :  { %v2056_v32 = vmax.f32 %v2038_v21, 0.0  ;;  %v2041_v46 = vadd.f32 %v2305_v5, %v2040_v10  ;;  %v2166_v5 = vadd.s32 4294967248, %v2126_v19 }
 0x740   :  { %v2073_v3 = vmul.f32 %v2312_v49, %v2058_v48  ;;  %v2059_v28 = vmax.f32 %v2049_v51, 0.0 }
 0x741   :  { %v2057_v18 = vmax.f32 %v2041_v46, 0.0  ;;  %v2071_v37 = vmul.f32 %v2312_v49, %v2056_v32  ;;  %v2169_v61 = vsub.s32 %v2166_v5, %v2957_v27 }
 0x742   :  { %v2093_v30 = vsel %vm839_vm3, %v2073_v3, 0.0  ;;  %v2074_v22 = vmul.f32 %v2312_v49, %v2059_v28 }
 0x743   :  { %v2072_v16 = vmul.f32 %v2312_v49, %v2057_v18  ;;  %2094 = vadd.xlane.f32.xlu1 %v2093_v30  ;;  %v2087_v39 = vsel %vm839_vm3, %v2071_v37, 0.0 }
 0x744   :  { %v2096_v6 = vsel %vm839_vm3, %v2074_v22, 0.0 }
 0x745   :  { %v2090_v55 = vsel %vm839_vm3, %v2072_v16, 0.0  ;;  %vm2136_vm3 = vcmask 130112  }
 0x746   :  { %2091 = vadd.xlane.f32.xlu0 %v2090_v55 }
 0x747   :  { %2088 = vadd.xlane.f32.xlu1 %v2087_v39 }
 0x74b   :  { %2097 = vadd.xlane.f32.xlu1 %v2096_v6 }
 0x75c   :  { %2102 = vperm.xlu0 %2484, %v2099_v31  }
 0x7c1   :  { %v2083_v11 = vpop.xlane.xlu0 %2082 }
 0x7c4   :  { %v2080_v52 = vpop.xlane.xlu1 %2079 }
 0x7c5   :  { %v2077_v56 = vpop.xlane.xlu0 %2076 }
 0x7c9   :  { %v2086_v35 = vpop.xlane.xlu0 %2085 }
 0x7d0   :  { %v2095_v7 = vpop.xlane.xlu1 %2094 }
 0x7d3   :  { %v2092_v54 = vpop.xlane.xlu0 %2091 }
 0x7d4   :  { %v2089_v4 = vpop.xlane.xlu1 %2088 }
 0x7d8   :  { %v2098_v36 = vpop.xlane.xlu1 %2097 }
 0x7db   :  { %v2103_v29 = vpop.permute.xlu0 %2102 }
 0x7dc   :  { %v2108_v8 = vrot.slane %v2103_v29, %v187_v0  ;;  %v2162_v0 = vsub.s32 %v2159_v2, %v2957_v27 }
 0x7de   :  { %v2109_v41 = vadd.f32 %v2108_v8, %v2077_v56  ;;  %v2110_v38 = vadd.f32 %v2108_v8, %v2080_v52  ;;  %v2111_v49 = vadd.f32 %v2108_v8, %v2083_v11  ;;  %v2112_v40 = vadd.f32 %v2108_v8, %v2086_v35 }
 0x7df   :  { %v2113_v42 = vadd.f32 %v2108_v8, %v2089_v4  ;;  %v2114_v12 = vadd.f32 %v2108_v8, %v2092_v54  ;;  %v2115_v34 = vadd.f32 %v2108_v8, %v2095_v7  ;;  %v2116_v44 = vadd.f32 %v2108_v8, %v2098_v36 }
 0x7e0   :  { %v2130_v60 = vrot.slane %v2109_v41, %v2129_v25  ;;  %v2135_v17 = vrot.slane %v2110_v38, %v2134_v53  ;;  %v2142_v43 = vrot.slane %v2111_v49, %v2141_v24  ;;  %v2149_v63 = vrot.slane %v2112_v40, %v2148_v26 }
 0x7e1   :  { %v2156_v59 = vrot.slane %v2113_v42, %v2155_v57  ;;  %v2163_v45 = vrot.slane %v2114_v12, %v2162_v0  ;;  %v2170_v15 = vrot.slane %v2115_v34, %v2169_v61  ;;  %v2177_v13 = vrot.slane %v2116_v44, %v2176_v58 }
 0x7e2   :  { %v2137_v20 = vsel %vm2136_vm3, %v2135_v17, %v2130_v60 }
 0x7e3   :  { %v2144_v14 = vsel %vm2143_vm4, %v2142_v43, %v2137_v20 }
 0x7e4   :  { %v2151_v1 = vsel %vm2150_vm5, %v2149_v63, %v2144_v14 }
 0x7e5   :  { %v2158_v9 = vsel %vm2157_vm6, %v2156_v59, %v2151_v1 }
 0x7e6   :  { %v2165_v21 = vsel %vm2164_vm7, %v2163_v45, %v2158_v9 }
 0x7e7   :  { %v2172_v27 = vsel %vm2171_vm8, %v2170_v15, %v2165_v21 }
 0x7e8   :  { %v2179_v48 = vsel %vm2178_vm9, %v2177_v13, %v2172_v27 }
 0x7e9   :  { %2182 = vst.msk [vmem:[#allocation3] sm:$0x1] %vm2181_vm10, %v2179_v48 }
 0x7ea   :  { %2626 = shalt.err (!%p2623_p4)
}
 0x7eb   :  { %s2627_s14 = scalar_lea.hbm %s3699_s13, 16 }
 0x7ec   :  { %p2628_p5 = scmp.ne.s32.totalorder %s3699_s13, %s2627_s14  ;;  %p2631_p6 = scmp.lt.u32.totalorder %s2627_s14, %s3699_s13 }
 0x7ee   :  { %p2633_p7 = pnand %p2631_p6, %p2628_p5 }
 0x7f0   :  { %2636 = shalt.err (!%p2633_p7)
}
 0x7f1   :  { %2192 = dma.vmem_to_hbm [thread:$0]  %s2190_s11, 16, %s3699_s13, [#allocation4]  }
 0x7f2   :  { %2637 = dma.done.wait [#allocation4], 16  }
 0x7f3   :  { %2638 = vsyncadd [#allocation4], 4294967280 }
 0x7f4   :  { %2196 = vsyncpa [#allocation4], 1 }

</bundles_post_ra>
